<compile_context>
chip_gen: v5e
topology: v5e:2x2
jax: 0.10.0
libtpu: 0.0.40
codegen_flags: <defaults>
</compile_context>

<pallas_src>
import functools

import jax
import jax.numpy as jnp
import numpy as np
from jax.experimental import pallas as pl
from jax.experimental.pallas import tpu as pltpu

LANE = 128
SUB = 8


# ----------------------------------------------------------------------------
# helpers
# ----------------------------------------------------------------------------
def _round_up(x, m):
    return ((x + m - 1) // m) * m


def _pad2(x, rows, cols, dtype):
    x = jnp.asarray(x, dtype)
    return jnp.pad(x, ((0, rows - x.shape[0]), (0, cols - x.shape[1])))


def _vmem_capacity_bytes():
    """Per-core VMEM capacity (generation-aware), conservative fallback."""
    try:
        info = pltpu.get_tpu_info()
        cap = getattr(info, "vmem_capacity_bytes", None)
        if cap:
            return int(cap)
    except Exception:
        pass
    return 64 * 1024 * 1024  # v7x per-core size: safest assumption


def _clamp_vmem_limit(resident_bytes, cap_bytes):
    # ~20% compiler-scratch headroom below physical VMEM.
    ceiling = int(0.8 * cap_bytes)
    want = int(1.5 * resident_bytes) + (4 << 20)
    return max(min(want, ceiling), min(32 << 20, ceiling))


# ----------------------------------------------------------------------------
# Kernel 1: fused encoder (encode1, encode2, combine1) — gridless, VMEM-resident
# ----------------------------------------------------------------------------
def vbgae_encoder_kernel(adj_ref, adjT_ref, spT_ref, x1_ref, x2_ref,
                         w_b1_ref, w_ms1_ref, w_c1_ref,
                         w_b2_ref, w_ms2_ref,
                         noise1_ref, noise2_ref,
                         z1_ref, z2_ref, z3_ref,
                         *, h2p, compute_dtype):
    cd = compute_dtype

    def mm(a, b):  # MXU matmul, f32 accumulation
        return jnp.dot(a, b, preferred_element_type=jnp.float32)

    adj = adj_ref[...]       # (n1p, mp)  pre-cast to compute_dtype in wrapper
    adjT = adjT_ref[...]     # (mp, n1p)  transpose + cast hoisted to wrapper

    # ---- encode1: GraphConvSparse(relu) then fused mean|logstd GCN --------
    # base_gcn1:      relu(adj.T @ (X1 @ W_b1))            -> (mp, h1p)
    h1 = jnp.maximum(mm(adjT, mm(x1_ref[...], w_b1_ref[...]).astype(cd)), 0.0)
    # gcn_mean1|gcn_logstddev1 (fused weights): adj @ (h1 @ [Wm|Ws])
    ms1 = mm(adj, mm(h1.astype(cd), w_ms1_ref[...]).astype(cd))   # (n1p, 2*h2p)
    mean1, logstd1 = ms1[:, :h2p], ms1[:, h2p:]
    z1 = noise1_ref[...] * jnp.exp(logstd1) + mean1               # f32 elementwise

    # ---- encode2 -----------------------------------------------------------
    h2 = jnp.maximum(mm(adj, mm(x2_ref[...], w_b2_ref[...]).astype(cd)), 0.0)
    ms2 = mm(adjT, mm(h2.astype(cd), w_ms2_ref[...]).astype(cd))  # (mp, 2*h2p)
    mean2, logstd2 = ms2[:, :h2p], ms2[:, h2p:]
    z2 = noise2_ref[...] * jnp.exp(logstd2) + mean2

    # ---- combine1: species.T @ (Z1 @ W_c1) ---------------------------------
    z3 = mm(spT_ref[...], mm(z1.astype(cd), w_c1_ref[...]).astype(cd))

    z1_ref[...] = z1
    z2_ref[...] = z2
    z3_ref[...] = z3


# ----------------------------------------------------------------------------
# Kernel 2: tiled decoder — A_pred_all = sigmoid([Z1; Z3] @ Z2^T)
# ----------------------------------------------------------------------------
def decoder_tile_kernel(zrow_ref, z2t_ref, out_ref):
    s = jnp.dot(zrow_ref[...], z2t_ref[...], preferred_element_type=jnp.float32)
    # sigmoid: exp and the approximate reciprocal both stay on the EUP slot.
    out_ref[...] = pl.reciprocal(1.0 + jnp.exp(-s), approx=True).astype(out_ref.dtype)


# ----------------------------------------------------------------------------
# Wrapper
# ----------------------------------------------------------------------------
def vbgae_forward(adj, species, X1, X2, params, noise1, noise2,
                  *, matmul_dtype=jnp.bfloat16, apred_dtype=jnp.bfloat16):
    n1, m = adj.shape
    s = species.shape[1]
    d1, d2 = X1.shape[1], X2.shape[1]
    h1d1, h1d2 = params["w_b1"].shape[1], params["w_b2"].shape[1]
    h2d1, h2d2 = params["w_m1"].shape[1], params["w_m2"].shape[1]
    assert h2d1 == h2d2, "decoder requires hidden2_dim1 == hidden2_dim2"

    cd = matmul_dtype
    cdb = np.dtype(cd).itemsize
    f32 = jnp.float32

    n1p = _round_up(n1, LANE)       # n1 is a lane dim for adj.T / species.T
    mp = _round_up(m, LANE)
    sp = _round_up(s, SUB)          # s only ever sits on the sublane axis
    d1p = _round_up(d1, LANE)
    d2p = _round_up(d2, LANE)
    h1p = _round_up(max(h1d1, h1d2), LANE)
    h2p = _round_up(h2d1, LANE)

    # Matmul operands pre-cast to the MXU dtype (adjacency is 0/1 -> exact).
    adj_p = _pad2(adj, n1p, mp, cd)
    adjT_p = _pad2(adj.T, mp, n1p, cd)            # transpose hoisted to XLA
    spT_p = _pad2(species.T, sp, n1p, cd)
    x1_p = _pad2(X1, n1p, d1p, cd)
    x2_p = _pad2(X2, mp, d2p, cd)
    w_b1_p = _pad2(params["w_b1"], d1p, h1p, cd)
    w_b2_p = _pad2(params["w_b2"], d2p, h1p, cd)
    w_ms1_p = jnp.concatenate([_pad2(params["w_m1"], h1p, h2p, cd),
                               _pad2(params["w_s1"], h1p, h2p, cd)], axis=1)
    w_ms2_p = jnp.concatenate([_pad2(params["w_m2"], h1p, h2p, cd),
                               _pad2(params["w_s2"], h1p, h2p, cd)], axis=1)
    w_c1_p = _pad2(params["w_c1"], h2p, h2p, cd)
    # Noise / reparameterization stay f32.
    noise1_p = _pad2(noise1, n1p, h2p, f32)
    noise2_p = _pad2(noise2, mp, h2p, f32)

    vmem_cap = _vmem_capacity_bytes()

    # Honest resident-footprint estimate for the gridless encoder:
    # inputs + outputs + major f32 intermediates + their compute-dtype copies.
    in_bytes = cdb * sum(int(np.prod(a.shape)) for a in
                         (adj_p, adjT_p, spT_p, x1_p, x2_p, w_b1_p, w_b2_p,
                          w_ms1_p, w_ms2_p, w_c1_p))
    in_bytes += 4 * (n1p * h2p + mp * h2p)                         # noise
    out_bytes = 4 * (n1p * h2p + mp * h2p + sp * h2p)              # z1, z2, z3
    inter_shapes = [(n1p, h1p), (mp, h1p), (mp, 2 * h2p), (n1p, 2 * h2p),
                    (mp, h1p), (n1p, h1p), (n1p, 2 * h2p), (mp, 2 * h2p),
                    (n1p, h2p)]
    inter_bytes = (4 + cdb) * sum(int(np.prod(sh)) for sh in inter_shapes)
    resident = in_bytes + out_bytes + inter_bytes
    if resident > int(0.8 * vmem_cap):
        # TODO(synk): tile the encoder GCN chain over node-row blocks for
        # graphs this large instead of the all-in-VMEM fused encoder.
        raise ValueError(
            f"encoder footprint {resident / 2**20:.1f} MiB exceeds VMEM budget "
            f"{0.8 * vmem_cap / 2**20:.1f} MiB; needs the tiled encoder path")

    vmem = pl.BlockSpec(memory_space=pltpu.MemorySpace.VMEM)
    enc_kernel = functools.partial(vbgae_encoder_kernel, h2p=h2p,
                                   compute_dtype=cd)
    z1p, z2p, z3p = pl.pallas_call(
        enc_kernel,
        out_shape=(jax.ShapeDtypeStruct((n1p, h2p), f32),
                   jax.ShapeDtypeStruct((mp, h2p), f32),
                   jax.ShapeDtypeStruct((sp, h2p), f32)),
        in_specs=[vmem] * 12,
        out_specs=(vmem, vmem, vmem),
        compiler_params=pltpu.CompilerParams(
            vmem_limit_bytes=_clamp_vmem_limit(resident, vmem_cap)),
    )(adj_p, adjT_p, spT_p, x1_p, x2_p,
      w_b1_p, w_ms1_p, w_c1_p, w_b2_p, w_ms2_p,
      noise1_p, noise2_p)

    # ---- tiled, pipelined decoder ------------------------------------------
    rows = n1p + sp
    tm = _round_up(rows, SUB) if rows <= 512 else 256
    rows_p = _round_up(rows, tm)
    tn = next(t for t in (1024, 512, 256, 128) if mp % t == 0)

    zrows = jnp.concatenate([z1p, z3p], axis=0)          # cheap XLA concat
    zrows_p = _pad2(zrows, rows_p, h2p, cd)
    z2t_p = jnp.asarray(z2p.T, cd)                       # one transpose, (h2p, mp)

    tile_bytes = (2 * cdb * (tm * h2p + h2p * tn)
                  + 2 * np.dtype(apred_dtype).itemsize * tm * tn)
    dec_limit = _clamp_vmem_limit(tile_bytes, vmem_cap)

    apred_all = pl.pallas_call(
        decoder_tile_kernel,
        out_shape=jax.ShapeDtypeStruct((rows_p, mp), apred_dtype),
        grid_spec=pltpu.PrefetchScalarGridSpec(
            num_scalar_prefetch=0,
            grid=(rows_p // tm, mp // tn),
            in_specs=[pl.BlockSpec((tm, h2p), lambda i, j: (i, 0)),
                      pl.BlockSpec((h2p, tn), lambda i, j: (0, j))],
            out_specs=pl.BlockSpec((tm, tn), lambda i, j: (i, j))),
        compiler_params=pltpu.CompilerParams(
            dimension_semantics=("parallel", "parallel"),
            vmem_limit_bytes=dec_limit),
    )(zrows_p, z2t_p)

    a_pred = apred_all[:n1, :m]
    a_pred2 = apred_all[n1p:n1p + s, :m]
    return (a_pred, a_pred2,
            z1p[:n1, :h2d1], z2p[:m, :h2d2], z3p[:s, :h2d1])


# ----------------------------------------------------------------------------
# Reference + deterministic init (matches glorot_init ranges)
# ----------------------------------------------------------------------------
def glorot_init(key, in_dim, out_dim):
    r = np.sqrt(6.0 / (in_dim + out_dim))
    return jax.random.uniform(key, (in_dim, out_dim), jnp.float32, -r, r)


def reference_forward(adj, species, X1, X2, p, noise1, noise2):
    """Pure-JAX reference mirroring the PyTorch module semantics."""
    adjT = adj.T
    h1 = jax.nn.relu(adjT @ (X1 @ p["w_b1"]))
    mean1 = adj @ (h1 @ p["w_m1"])
    logstd1 = adj @ (h1 @ p["w_s1"])
    z1 = noise1 * jnp.exp(logstd1) + mean1
    h2 = jax.nn.relu(adj @ (X2 @ p["w_b2"]))
    mean2 = adjT @ (h2 @ p["w_m2"])
    logstd2 = adjT @ (h2 @ p["w_s2"])
    z2 = noise2 * jnp.exp(logstd2) + mean2
    z3 = species.T @ (z1 @ p["w_c1"])
    a_pred = jax.nn.sigmoid(z1 @ z2.T)
    a_pred2 = jax.nn.sigmoid(z3 @ z2.T)
    return a_pred, a_pred2, z1, z2, z3


def _f32(x):
    return np.asarray(jnp.asarray(x, jnp.float32))


if __name__ == "__main__":
    # Small shapes consistent with the module:
    n1, m, s = 16, 24, 8               # set-1 nodes, set-2 nodes, #species
    input_dim1, input_dim2 = 16, 24
    hidden1_dim1 = hidden1_dim2 = 32
    hidden2_dim1 = hidden2_dim2 = 16   # must match for Z1 @ Z2.T

    key = jax.random.PRNGKey(0)
    ks = jax.random.split(key, 12)

    adj = (jax.random.uniform(ks[0], (n1, m)) < 0.3).astype(jnp.float32)
    species = (jax.random.uniform(ks[1], (n1, s)) < 0.3).astype(jnp.float32)
    X1 = jax.random.normal(ks[2], (n1, input_dim1), jnp.float32)
    X2 = jax.random.normal(ks[3], (m, input_dim2), jnp.float32)

    params = {
        "w_b1": glorot_init(ks[4], input_dim1, hidden1_dim1),
        "w_m1": glorot_init(ks[5], hidden1_dim1, hidden2_dim1),
        "w_s1": glorot_init(ks[6], hidden1_dim1, hidden2_dim1),
        "w_c1": glorot_init(ks[7], hidden2_dim1, hidden2_dim1),
        "w_b2": glorot_init(ks[8], input_dim2, hidden1_dim2),
        "w_m2": glorot_init(ks[9], hidden1_dim2, hidden2_dim2),
        "w_s2": glorot_init(ks[10], hidden1_dim2, hidden2_dim2),
    }

    # The PyTorch module samples torch.randn inside forward; the gaussian
    # noise is passed in explicitly (deterministic) so the kernels are pure.
    kn1, kn2 = jax.random.split(ks[11])
    noise1 = jax.random.normal(kn1, (n1, hidden2_dim1), jnp.float32)
    noise2 = jax.random.normal(kn2, (m, hidden2_dim2), jnp.float32)

    refs = reference_forward(adj, species, X1, X2, params, noise1, noise2)

    # ---- strict f32 matmul / f32 output path: correctness check ------------
    outs = vbgae_forward(adj, species, X1, X2, params, noise1, noise2,
                         matmul_dtype=jnp.float32, apred_dtype=jnp.float32)
    outs = jax.block_until_ready(outs)
    # A_pred uses the EUP approximate reciprocal -> slightly looser tolerance.
    np.testing.assert_allclose(_f32(outs[0]), _f32(refs[0]), rtol=2e-2, atol=2e-2)
    np.testing.assert_allclose(_f32(outs[1]), _f32(refs[1]), rtol=2e-2, atol=2e-2)
    for o, r in zip(outs[2:], refs[2:]):
        np.testing.assert_allclose(_f32(o), _f32(r), rtol=1e-3, atol=1e-3)

    # ---- default production path: bf16 matmuls (MXU-native on v5e/v6e/v7x),
    #      bf16 A_pred output.  exp(logstd) amplifies bf16 operand rounding,
    #      so only finiteness is asserted here.
    outs_fast = vbgae_forward(adj, species, X1, X2, params, noise1, noise2)
    outs_fast = jax.block_until_ready(outs_fast)
    for o in outs_fast:
        assert bool(jnp.isfinite(jnp.asarray(o, jnp.float32)).all()), \
            "non-finite value in bf16 path"

    print("KERNEL_OK")
</pallas_src>

<mosaic_0001>
module attributes {stable_mosaic.version = 11 : i64} {
  func.func @vbgae_encoder_kernel(%arg0: memref<128x128xf32, #tpu.memory_space<vmem>>, %arg1: memref<128x128xf32, #tpu.memory_space<vmem>>, %arg2: memref<8x128xf32, #tpu.memory_space<vmem>>, %arg3: memref<128x128xf32, #tpu.memory_space<vmem>>, %arg4: memref<128x128xf32, #tpu.memory_space<vmem>>, %arg5: memref<128x128xf32, #tpu.memory_space<vmem>>, %arg6: memref<128x256xf32, #tpu.memory_space<vmem>>, %arg7: memref<128x128xf32, #tpu.memory_space<vmem>>, %arg8: memref<128x128xf32, #tpu.memory_space<vmem>>, %arg9: memref<128x256xf32, #tpu.memory_space<vmem>>, %arg10: memref<128x128xf32, #tpu.memory_space<vmem>>, %arg11: memref<128x128xf32, #tpu.memory_space<vmem>>, %arg12: memref<128x128xf32, #tpu.memory_space<vmem>>, %arg13: memref<128x128xf32, #tpu.memory_space<vmem>>, %arg14: memref<8x128xf32, #tpu.memory_space<vmem>>) attributes {dimension_semantics = [], scalar_prefetch = 0 : i64, scratch_operands = 0 : i64, tpu.core_type = #tpu.core_type<tc>} {
    %c0 = arith.constant 0 : index
    %c0_0 = arith.constant 0 : index
    %0 = vector.load %arg0[%c0, %c0_0] : memref<128x128xf32, #tpu.memory_space<vmem>>, vector<128x128xf32>
    %c0_1 = arith.constant 0 : index
    %c0_2 = arith.constant 0 : index
    %1 = vector.load %arg1[%c0_1, %c0_2] : memref<128x128xf32, #tpu.memory_space<vmem>>, vector<128x128xf32>
    %c0_3 = arith.constant 0 : index
    %c0_4 = arith.constant 0 : index
    %2 = vector.load %arg3[%c0_3, %c0_4] : memref<128x128xf32, #tpu.memory_space<vmem>>, vector<128x128xf32>
    %c0_5 = arith.constant 0 : index
    %c0_6 = arith.constant 0 : index
    %3 = vector.load %arg5[%c0_5, %c0_6] : memref<128x128xf32, #tpu.memory_space<vmem>>, vector<128x128xf32>
    %cst = arith.constant dense<0.000000e+00> : vector<128x128xf32>
    %4 = tpu.matmul %2, %3, %cst {dimension_numbers = #tpu.dot_dimension_numbers<[1], [0], [0], [1], [0, 0, 1, 1], [], []>} : vector<128x128xf32>, vector<128x128xf32>, vector<128x128xf32> -> vector<128x128xf32>
    %cst_7 = arith.constant dense<0.000000e+00> : vector<128x128xf32>
    %5 = tpu.matmul %1, %4, %cst_7 {dimension_numbers = #tpu.dot_dimension_numbers<[1], [0], [0], [1], [0, 0, 1, 1], [], []>} : vector<128x128xf32>, vector<128x128xf32>, vector<128x128xf32> -> vector<128x128xf32>
    %cst_8 = arith.constant 0.000000e+00 : f32
    %6 = vector.broadcast %cst_8 : f32 to vector<128x128xf32>
    %7 = arith.maximumf %5, %6 : vector<128x128xf32>
    %c0_9 = arith.constant 0 : index
    %c0_10 = arith.constant 0 : index
    %8 = vector.load %arg6[%c0_9, %c0_10] : memref<128x256xf32, #tpu.memory_space<vmem>>, vector<128x256xf32>
    %cst_11 = arith.constant dense<0.000000e+00> : vector<128x256xf32>
    %9 = tpu.matmul %7, %8, %cst_11 {dimension_numbers = #tpu.dot_dimension_numbers<[1], [0], [0], [1], [0, 0, 1, 1], [], []>} : vector<128x128xf32>, vector<128x256xf32>, vector<128x256xf32> -> vector<128x256xf32>
    %cst_12 = arith.constant dense<0.000000e+00> : vector<128x256xf32>
    %10 = tpu.matmul %0, %9, %cst_12 {dimension_numbers = #tpu.dot_dimension_numbers<[1], [0], [0], [1], [0, 0, 1, 1], [], []>} : vector<128x128xf32>, vector<128x256xf32>, vector<128x256xf32> -> vector<128x256xf32>
    %11 = vector.extract_strided_slice %10 {offsets = [0, 0], sizes = [128, 128], strides = [1, 1]} : vector<128x256xf32> to vector<128x128xf32>
    %12 = vector.extract_strided_slice %10 {offsets = [0, 128], sizes = [128, 128], strides = [1, 1]} : vector<128x256xf32> to vector<128x128xf32>
    %c0_13 = arith.constant 0 : index
    %c0_14 = arith.constant 0 : index
    %13 = vector.load %arg10[%c0_13, %c0_14] : memref<128x128xf32, #tpu.memory_space<vmem>>, vector<128x128xf32>
    %14 = math.exp %12 : vector<128x128xf32>
    %15 = arith.mulf %13, %14 : vector<128x128xf32>
    %16 = arith.addf %15, %11 : vector<128x128xf32>
    %c0_15 = arith.constant 0 : index
    %c0_16 = arith.constant 0 : index
    %17 = vector.load %arg4[%c0_15, %c0_16] : memref<128x128xf32, #tpu.memory_space<vmem>>, vector<128x128xf32>
    %c0_17 = arith.constant 0 : index
    %c0_18 = arith.constant 0 : index
    %18 = vector.load %arg8[%c0_17, %c0_18] : memref<128x128xf32, #tpu.memory_space<vmem>>, vector<128x128xf32>
    %cst_19 = arith.constant dense<0.000000e+00> : vector<128x128xf32>
    %19 = tpu.matmul %17, %18, %cst_19 {dimension_numbers = #tpu.dot_dimension_numbers<[1], [0], [0], [1], [0, 0, 1, 1], [], []>} : vector<128x128xf32>, vector<128x128xf32>, vector<128x128xf32> -> vector<128x128xf32>
    %cst_20 = arith.constant dense<0.000000e+00> : vector<128x128xf32>
    %20 = tpu.matmul %0, %19, %cst_20 {dimension_numbers = #tpu.dot_dimension_numbers<[1], [0], [0], [1], [0, 0, 1, 1], [], []>} : vector<128x128xf32>, vector<128x128xf32>, vector<128x128xf32> -> vector<128x128xf32>
    %cst_21 = arith.constant 0.000000e+00 : f32
    %21 = vector.broadcast %cst_21 : f32 to vector<128x128xf32>
    %22 = arith.maximumf %20, %21 : vector<128x128xf32>
    %c0_22 = arith.constant 0 : index
    %c0_23 = arith.constant 0 : index
    %23 = vector.load %arg9[%c0_22, %c0_23] : memref<128x256xf32, #tpu.memory_space<vmem>>, vector<128x256xf32>
    %cst_24 = arith.constant dense<0.000000e+00> : vector<128x256xf32>
    %24 = tpu.matmul %22, %23, %cst_24 {dimension_numbers = #tpu.dot_dimension_numbers<[1], [0], [0], [1], [0, 0, 1, 1], [], []>} : vector<128x128xf32>, vector<128x256xf32>, vector<128x256xf32> -> vector<128x256xf32>
    %cst_25 = arith.constant dense<0.000000e+00> : vector<128x256xf32>
    %25 = tpu.matmul %1, %24, %cst_25 {dimension_numbers = #tpu.dot_dimension_numbers<[1], [0], [0], [1], [0, 0, 1, 1], [], []>} : vector<128x128xf32>, vector<128x256xf32>, vector<128x256xf32> -> vector<128x256xf32>
    %26 = vector.extract_strided_slice %25 {offsets = [0, 0], sizes = [128, 128], strides = [1, 1]} : vector<128x256xf32> to vector<128x128xf32>
    %27 = vector.extract_strided_slice %25 {offsets = [0, 128], sizes = [128, 128], strides = [1, 1]} : vector<128x256xf32> to vector<128x128xf32>
    %c0_26 = arith.constant 0 : index
    %c0_27 = arith.constant 0 : index
    %28 = vector.load %arg11[%c0_26, %c0_27] : memref<128x128xf32, #tpu.memory_space<vmem>>, vector<128x128xf32>
    %29 = math.exp %27 : vector<128x128xf32>
    %30 = arith.mulf %28, %29 : vector<128x128xf32>
    %31 = arith.addf %30, %26 : vector<128x128xf32>
    %c0_28 = arith.constant 0 : index
    %c0_29 = arith.constant 0 : index
    %32 = vector.load %arg2[%c0_28, %c0_29] : memref<8x128xf32, #tpu.memory_space<vmem>>, vector<8x128xf32>
    %c0_30 = arith.constant 0 : index
    %c0_31 = arith.constant 0 : index
    %33 = vector.load %arg7[%c0_30, %c0_31] : memref<128x128xf32, #tpu.memory_space<vmem>>, vector<128x128xf32>
    %cst_32 = arith.constant dense<0.000000e+00> : vector<128x128xf32>
    %34 = tpu.matmul %16, %33, %cst_32 {dimension_numbers = #tpu.dot_dimension_numbers<[1], [0], [0], [1], [0, 0, 1, 1], [], []>} : vector<128x128xf32>, vector<128x128xf32>, vector<128x128xf32> -> vector<128x128xf32>
    %cst_33 = arith.constant dense<0.000000e+00> : vector<8x128xf32>
    %35 = tpu.matmul %32, %34, %cst_33 {dimension_numbers = #tpu.dot_dimension_numbers<[1], [0], [0], [1], [0, 0, 1, 1], [], []>} : vector<8x128xf32>, vector<128x128xf32>, vector<8x128xf32> -> vector<8x128xf32>
    %c0_34 = arith.constant 0 : index
    %c0_35 = arith.constant 0 : index
    %36 = vector.load %arg12[%c0_34, %c0_35] : memref<128x128xf32, #tpu.memory_space<vmem>>, vector<128x128xf32>
    tpu.vector_store %arg12[%c0_34, %c0_35], %16 {strides = array<i32>} : memref<128x128xf32, #tpu.memory_space<vmem>>, vector<128x128xf32>,
    %c0_36 = arith.constant 0 : index
    %c0_37 = arith.constant 0 : index
    %37 = vector.load %arg13[%c0_36, %c0_37] : memref<128x128xf32, #tpu.memory_space<vmem>>, vector<128x128xf32>
    tpu.vector_store %arg13[%c0_36, %c0_37], %31 {strides = array<i32>} : memref<128x128xf32, #tpu.memory_space<vmem>>, vector<128x128xf32>,
    %c0_38 = arith.constant 0 : index
    %c0_39 = arith.constant 0 : index
    %38 = vector.load %arg14[%c0_38, %c0_39] : memref<8x128xf32, #tpu.memory_space<vmem>>, vector<8x128xf32>
    tpu.vector_store %arg14[%c0_38, %c0_39], %35 {strides = array<i32>} : memref<8x128xf32, #tpu.memory_space<vmem>>, vector<8x128xf32>,
    return
  }
}

</mosaic_0001>

<bundles_post_ra>
// kernel: tpu_custom_call.1
= control target key start
LH: loop header
LB: loop body
LE: loop exit
PB: predicated region body
PF: predicated region fallthrough
CT: control target
= control target key end

     0   :  { %20 = vsyncpa [#allocation3], 0  ;;  %s2416_s0 = inlined_call_operand.hbm [shape: f32[128,128], index: 0, kind: input, shape index: {}]   ;;  %s2417_s1 = inlined_call_operand.hbm [shape: f32[128,128], index: 1, kind: input, shape index: {}]   ;;  %s2418_s2 = inlined_call_operand.hbm [shape: f32[8,128], index: 2, kind: input, shape index: {}]   ;;  %s2419_s3 = inlined_call_operand.hbm [shape: f32[128,128], index: 3, kind: input, shape index: {}]   ;;  %s2420_s4 = inlined_call_operand.hbm [shape: f32[128,128], index: 4, kind: input, shape index: {}]   ;;  %s2421_s5 = inlined_call_operand.hbm [shape: f32[128,128], index: 5, kind: input, shape index: {}]   ;;  %s2422_s6 = inlined_call_operand.hbm [shape: f32[128,256], index: 6, kind: input, shape index: {}]   ;;  %s2423_s7 = inlined_call_operand.hbm [shape: f32[128,128], index: 7, kind: input, shape index: {}]   ;;  %s2424_s8 = inlined_call_operand.hbm [shape: f32[128,128], index: 8, kind: input, shape index: {}]   ;;  %s2425_s9 = inlined_call_operand.hbm [shape: f32[128,256], index: 9, kind: input, shape index: {}]   ;;  %s2426_s10 = inlined_call_operand.hbm [shape: f32[128,128], index: 10, kind: input, shape index: {}]   ;;  %s2427_s11 = inlined_call_operand.hbm [shape: f32[128,128], index: 11, kind: input, shape index: {}]   ;;  %s2428_s12 = inlined_call_operand.hbm [shape: f32[128,128], index: 12, kind: output, shape index: {0}]   ;;  %s2429_s13 = inlined_call_operand.hbm [shape: f32[128,128], index: 13, kind: output, shape index: {1}]   ;;  %s2430_s14 = inlined_call_operand.hbm [shape: f32[8,128], index: 14, kind: output, shape index: {2}]  }
   0x1   :  { %21 = vsyncpa [#allocation6], 0 }
   0x2   :  { %22 = vsyncpa [#allocation9], 0 }
   0x3   :  { %23 = vsyncpa [#allocation12], 0 }
   0x4   :  { %24 = vsyncpa [#allocation15], 0 }
   0x5   :  { %25 = vsyncpa [#allocation18], 0 }
   0x6   :  { %26 = vsyncpa [#allocation21], 0 }
   0x7   :  { %27 = vsyncpa [#allocation4], 0 }
   0x8   :  { %28 = vsyncpa [#allocation24], 0  ;;  %s46_s15 = sshll.u32 %s2417_s1, 4  ;;  %s2081_s16 = smov [#allocation5]   ;;  %s47_s15 = int_to_ptr.hbm [resolvable:$true] %s46_s15 }
   0x9   :  { %s48_s17 = sshll.u32 %s2081_s16, 4  ;;  %s70_s20 = sshll.u32 %s2419_s3, 4  ;;  %s49_s17 = int_to_ptr.vmem [resolvable:$true] %s48_s17  ;;  %s71_s20 = int_to_ptr.hbm [resolvable:$true] %s70_s20 }
   0xa   :  { %s2082_s21 = smov 128   ;;  %s2083_s22 = smov 8  }
   0xb   :  { %54 = dma.hbm_to_vmem [thread:$0]  %s47_s15, 2048, %s49_s17, [#allocation6], %s2082_s21, %s2082_s21, %s2083_s22  }
   0xc   :  { %s2084_s23 = smov [#allocation8]   ;;  %s96_s1 = sshll.u32 %s2421_s5, 4  ;;  %s97_s1 = int_to_ptr.hbm [resolvable:$true] %s96_s1 }
   0xd   :  { %s72_s24 = sshll.u32 %s2084_s23, 4  ;;  %s122_s28 = sshll.u32 %s2423_s7, 4  ;;  %s73_s24 = int_to_ptr.vmem [resolvable:$true] %s72_s24  ;;  %s123_s28 = int_to_ptr.hbm [resolvable:$true] %s122_s28 }
   0xe   :  { %78 = dma.hbm_to_vmem [thread:$0]  %s71_s20, 2048, %s73_s24, [#allocation9], %s2082_s21, %s2082_s21, %s2083_s22  }
   0xf   :  { %s2085_s29 = smov [#allocation11]   ;;  %s2086_s15 = smov [#allocation14]  }
  0x10   :  { %s98_s30 = sshll.u32 %s2085_s29, 4  ;;  %s124_s5 = sshll.u32 %s2086_s15, 4  ;;  %s99_s30 = int_to_ptr.vmem [resolvable:$true] %s98_s30  ;;  %s125_s5 = int_to_ptr.vmem [resolvable:$true] %s124_s5 }
  0x11   :  { %104 = dma.hbm_to_vmem [thread:$0]  %s97_s1, 2048, %s99_s30, [#allocation12], %s2082_s21, %s2082_s21, %s2083_s22  }
  0x12   :  { %130 = dma.hbm_to_vmem [thread:$0]  %s123_s28, 2048, %s125_s5, [#allocation15], %s2082_s21, %s2082_s21, %s2083_s22  }
  0x13   :  { %s148_s18 = sshll.u32 %s2425_s9, 4  ;;  %s2087_s7 = smov [#allocation17]   ;;  %s149_s18 = int_to_ptr.hbm [resolvable:$true] %s148_s18 }
  0x14   :  { %s150_s19 = sshll.u32 %s2087_s7, 4  ;;  %s33_s24 = sshll.u32 %s2416_s0, 4  ;;  %s151_s19 = int_to_ptr.vmem [resolvable:$true] %s150_s19  ;;  %s34_s24 = int_to_ptr.hbm [resolvable:$true] %s33_s24 }
  0x15   :  { %s2088_s25 = smov 256   ;;  %s2089_s26 = smov 16  }
  0x16   :  { %156 = dma.hbm_to_vmem [thread:$0]  %s149_s18, 4096, %s151_s19, [#allocation18], %s2088_s25, %s2088_s25, %s2089_s26  }
  0x17   :  { %s2090_s1 = smov [#allocation2]   ;;  %s60_s9 = sshll.u32 %s2418_s2, 4  ;;  %s61_s9 = int_to_ptr.hbm [resolvable:$true] %s60_s9 }
  0x18   :  { %s35_s3 = sshll.u32 %s2090_s1, 4  ;;  %s83_s30 = sshll.u32 %s2420_s4, 4  ;;  %s36_s3 = int_to_ptr.vmem [resolvable:$true] %s35_s3  ;;  %s84_s30 = int_to_ptr.hbm [resolvable:$true] %s83_s30 }
  0x19   :  { %41 = dma.hbm_to_vmem [thread:$0]  %s34_s24, 2048, %s36_s3, [#allocation3], %s2082_s21, %s2082_s21, %s2083_s22  }
  0x1a   :  { %s2091_s15 = smov [#allocation7]   ;;  %s2092_s16 = smov [#allocation10]  }
  0x1b   :  { %s62_s5 = sshll.u32 %s2091_s15, 4  ;;  %s85_s17 = sshll.u32 %s2092_s16, 4  ;;  %s63_s5 = int_to_ptr.vmem [resolvable:$true] %s62_s5  ;;  %s86_s17 = int_to_ptr.vmem [resolvable:$true] %s85_s17 }
  0x1c   :  { %65 = dma.hbm_to_vmem [thread:$0]  %s61_s9, 128, %s63_s5, [#allocation6]  }
  0x1d   :  { %s109_s2 = sshll.u32 %s2422_s6, 4  ;;  %s135_s4 = sshll.u32 %s2424_s8, 4  ;;  %s110_s2 = int_to_ptr.hbm [resolvable:$true] %s109_s2  ;;  %s136_s4 = int_to_ptr.hbm [resolvable:$true] %s135_s4 }
  0x1e   :  { %91 = dma.hbm_to_vmem [thread:$0]  %s84_s30, 2048, %s86_s17, [#allocation9], %s2082_s21, %s2082_s21, %s2083_s22  }
  0x1f   :  { %s2093_s23 = smov [#allocation13]   ;;  %s2094_s1 = smov [#allocation16]  }
  0x20   :  { %s111_s24 = sshll.u32 %s2093_s23, 4  ;;  %s137_s6 = sshll.u32 %s2094_s1, 4  ;;  %s112_s24 = int_to_ptr.vmem [resolvable:$true] %s111_s24  ;;  %s138_s6 = int_to_ptr.vmem [resolvable:$true] %s137_s6 }
  0x21   :  { %117 = dma.hbm_to_vmem [thread:$0]  %s110_s2, 4096, %s112_s24, [#allocation12], %s2088_s25, %s2088_s25, %s2089_s26  }
  0x22   :  { %s161_s28 = sshll.u32 %s2426_s10, 4  ;;  %s174_s0 = sshll.u32 %s2427_s11, 4  ;;  %s162_s28 = int_to_ptr.hbm [resolvable:$true] %s161_s28  ;;  %s175_s0 = int_to_ptr.hbm [resolvable:$true] %s174_s0 }
  0x23   :  { %143 = dma.hbm_to_vmem [thread:$0]  %s136_s4, 2048, %s138_s6, [#allocation15], %s2082_s21, %s2082_s21, %s2083_s22  }
  0x24   :  { %s2095_s29 = smov [#allocation19]   ;;  %s2096_s25 = smov [#allocation20]  }
  0x25   :  { %s163_s30 = sshll.u32 %s2095_s29, 4  ;;  %s176_s10 = sshll.u32 %s2096_s25, 4  ;;  %s164_s30 = int_to_ptr.vmem [resolvable:$true] %s163_s30  ;;  %s177_s10 = int_to_ptr.vmem [resolvable:$true] %s176_s10 }
  0x26   :  { %169 = dma.hbm_to_vmem [thread:$0]  %s162_s28, 2048, %s164_s30, [#allocation18], %s2082_s21, %s2082_s21, %s2083_s22  }
  0x27   :  { %182 = dma.hbm_to_vmem [thread:$0]  %s175_s0, 2048, %s177_s10, [#allocation21], %s2082_s21, %s2082_s21, %s2083_s22  }
  0x28   :  { %2063 = dma.done.wait [#allocation3], 2048  }
  0x29   :  { %2064 = vsyncadd [#allocation3], 4294965248 }
  0x2a   :  { %2065 = dma.done.wait [#allocation6], 2176  }
  0x2b   :  { %2066 = vsyncadd [#allocation6], 4294965120 }
  0x2c   :  { %2067 = dma.done.wait [#allocation9], 4096  }
  0x2d   :  { %2068 = vsyncadd [#allocation9], 4294963200 }
  0x2e   :  { %2069 = dma.done.wait [#allocation12], 6144  }
  0x2f   :  { %2070 = vsyncadd [#allocation12], 4294961152 }
  0x30   :  { %2071 = dma.done.wait [#allocation15], 4096  }
  0x31   :  { %2072 = vsyncadd [#allocation15], 4294963200 }
  0x32   :  { %2073 = dma.done.wait [#allocation18], 6144  }
  0x33   :  { %2074 = vsyncadd [#allocation18], 4294961152 }
  0x34   :  { %2075 = dma.done.wait [#allocation21], 2048  }
  0x35   :  { %2076 = vsyncadd [#allocation21], 4294965248  ;;  %v294_v0 = vld [vmem:[#allocation11 + $0x78] sm:$0xff]  ;;  %v293_v1 = vld [vmem:[#allocation11 + $0x70] sm:$0xff]  ;;  %s1504_s15 = sshll.u32 %s2428_s12, 4  ;;  %s2097_s5 = smov [#allocation22]   ;;  %s1505_s15 = int_to_ptr.hbm [resolvable:$true] %s1504_s15 }
  0x36   :  { %1557 = vmatpush.msra.mxu2 %v294_v0  ;;  %1558 = vmatpush.msra.mxu3 %v294_v0  ;;  %v292_v2 = vld [vmem:[#allocation11 + $0x68] sm:$0xff]  ;;  %v291_v3 = vld [vmem:[#allocation11 + $0x60] sm:$0xff]  ;;  %v290_v4 = vld [vmem:[#allocation11 + $0x58] sm:$0xff]  ;;  %s1502_s16 = sshll.u32 %s2097_s5, 4  ;;  %s2098_s12 = smov [#allocation23]   ;;  %s1503_s16 = int_to_ptr.vmem [resolvable:$true] %s1502_s16 }
  0x37   :  { %295 = vmatpush.msra.mxu0 %v294_v0  ;;  %1556 = vmatpush.msra.mxu1 %v294_v0  ;;  %v289_v5 = vld [vmem:[#allocation11 + $0x50] sm:$0xff]  ;;  %v288_v6 = vld [vmem:[#allocation11 + $0x48] sm:$0xff]  ;;  %v287_v7 = vld [vmem:[#allocation11 + $0x40] sm:$0xff]  ;;  %s1515_s17 = sshll.u32 %s2098_s12, 4  ;;  %s1517_s2 = sshll.u32 %s2429_s13, 4  ;;  %s1516_s17 = int_to_ptr.vmem [resolvable:$true] %s1515_s17  ;;  %s1518_s2 = int_to_ptr.hbm [resolvable:$true] %s1517_s2 }
  0x38   :  { %1560 = vmatpush.msra.mxu2 %v293_v1  ;;  %1561 = vmatpush.msra.mxu3 %v293_v1  ;;  %v286_v8 = vld [vmem:[#allocation11 + $0x38] sm:$0xff]  ;;  %v285_v9 = vld [vmem:[#allocation11 + $0x30] sm:$0xff]  ;;  %v284_v10 = vld [vmem:[#allocation11 + $0x28] sm:$0xff]  ;;  %s2099_s19 = smov [#allocation25]   ;;  %s1531_s24 = sshll.u32 %s2430_s14, 4  ;;  %s1532_s24 = int_to_ptr.hbm [resolvable:$true] %s1531_s24 }
  0x39   :  { %296 = vmatpush.msra.mxu0 %v293_v1  ;;  %1559 = vmatpush.msra.mxu1 %v293_v1  ;;  %v283_v11 = vld [vmem:[#allocation11 + $0x20] sm:$0xff]  ;;  %v282_v12 = vld [vmem:[#allocation11 + $0x18] sm:$0xff]  ;;  %v281_v13 = vld [vmem:[#allocation11 + $0x10] sm:$0xff]  ;;  %s1529_s20 = sshll.u32 %s2099_s19, 4  ;;  %s1530_s20 = int_to_ptr.vmem [resolvable:$true] %s1529_s20 }
  0x3a   :  { %1563 = vmatpush.msra.mxu2 %v292_v2  ;;  %1564 = vmatpush.msra.mxu3 %v292_v2  ;;  %v280_v14 = vld [vmem:[#allocation11 + $0x8] sm:$0xff]  ;;  %v279_v15 = vld [vmem:[#allocation11] sm:$0xff]  ;;  %v270_v16 = vld [vmem:[#allocation8 + $0x38] sm:$0xff] }
  0x3b   :  { %297 = vmatpush.msra.mxu0 %v292_v2  ;;  %1562 = vmatpush.msra.mxu1 %v292_v2  ;;  %v275_v17 = vld [vmem:[#allocation8 + $0x60] sm:$0xff]  ;;  %v268_v19 = vld [vmem:[#allocation8 + $0x28] sm:$0xff]  ;;  %v269_v23 = vld [vmem:[#allocation8 + $0x30] sm:$0xff] }
  0x3c   :  { %1566 = vmatpush.msra.mxu2 %v291_v3  ;;  %1567 = vmatpush.msra.mxu3 %v291_v3  ;;  %v263_v18 = vld [vmem:[#allocation8] sm:$0xff]  ;;  %v276_v21 = vld [vmem:[#allocation8 + $0x68] sm:$0xff]  ;;  %v277_v25 = vld [vmem:[#allocation8 + $0x70] sm:$0xff] }
  0x3d   :  { %298 = vmatpush.msra.mxu0 %v291_v3  ;;  %1565 = vmatpush.msra.mxu1 %v291_v3  ;;  %v271_v20 = vld [vmem:[#allocation8 + $0x40] sm:$0xff]  ;;  %v264_v22 = vld [vmem:[#allocation8 + $0x8] sm:$0xff]  ;;  %v265_v26 = vld [vmem:[#allocation8 + $0x10] sm:$0xff] }
  0x3e   :  { %1569 = vmatpush.msra.mxu2 %v290_v4  ;;  %1570 = vmatpush.msra.mxu3 %v290_v4  ;;  %v272_v24 = vld [vmem:[#allocation8 + $0x48] sm:$0xff]  ;;  %v273_v27 = vld [vmem:[#allocation8 + $0x50] sm:$0xff]  ;;  %v278_v28 = vld [vmem:[#allocation8 + $0x78] sm:$0xff] }
  0x3f   :  { %299 = vmatpush.msra.mxu0 %v290_v4  ;;  %1568 = vmatpush.msra.mxu1 %v290_v4  ;;  %v266_v29 = vld [vmem:[#allocation8 + $0x18] sm:$0xff]  ;;  %v267_v31 = vld [vmem:[#allocation8 + $0x20] sm:$0xff]  ;;  %v249_v50 = vld [vmem:[#allocation5 + $0x10] sm:$0xff] }
  0x40   :  { %1572 = vmatpush.msra.mxu2 %v289_v5  ;;  %1573 = vmatpush.msra.mxu3 %v289_v5  ;;  %v274_v30 = vld [vmem:[#allocation8 + $0x58] sm:$0xff]  ;;  %v248_v49 = vld [vmem:[#allocation5 + $0x8] sm:$0xff]  ;;  %v250_v51 = vld [vmem:[#allocation5 + $0x18] sm:$0xff] }
  0x41   :  { %300 = vmatpush.msra.mxu0 %v289_v5  ;;  %1571 = vmatpush.msra.mxu1 %v289_v5  ;;  %v247_v48 = vld [vmem:[#allocation5] sm:$0xff]  ;;  %v252_v53 = vld [vmem:[#allocation5 + $0x28] sm:$0xff]  ;;  %v253_v54 = vld [vmem:[#allocation5 + $0x30] sm:$0xff] }
  0x42   :  { %1575 = vmatpush.msra.mxu2 %v288_v6  ;;  %1576 = vmatpush.msra.mxu3 %v288_v6  ;;  %v251_v52 = vld [vmem:[#allocation5 + $0x20] sm:$0xff]  ;;  %v254_v55 = vld [vmem:[#allocation5 + $0x38] sm:$0xff]  ;;  %v469_v59 = vld [vmem:[#allocation13 + $0xe0] sm:$0xff] }
  0x43   :  { %301 = vmatpush.msra.mxu0 %v288_v6  ;;  %1574 = vmatpush.msra.mxu1 %v288_v6  ;;  %v255_v56 = vld [vmem:[#allocation5 + $0x40] sm:$0xff]  ;;  %v471_v57 = vld [vmem:[#allocation13 + $0xf0] sm:$0xff]  ;;  %v470_v60 = vld [vmem:[#allocation13 + $0xe8] sm:$0xff] }
  0x44   :  { %1578 = vmatpush.msra.mxu2 %v287_v7  ;;  %1579 = vmatpush.msra.mxu3 %v287_v7  ;;  %v472_v58 = vld [vmem:[#allocation13 + $0xf8] sm:$0xff]  ;;  %v467_v61 = vld [vmem:[#allocation13 + $0xd0] sm:$0xff]  ;;  %v465_v63 = vld [vmem:[#allocation13 + $0xc0] sm:$0xff] }
  0x45   :  { %302 = vmatpush.msra.mxu0 %v287_v7  ;;  %1577 = vmatpush.msra.mxu1 %v287_v7  ;;  %v468_v62 = vld [vmem:[#allocation13 + $0xd8] sm:$0xff]  ;;  %v466_v0 = vld [vmem:[#allocation13 + $0xc8] sm:$0xff]  ;;  %v256_v1 = vld [vmem:[#allocation5 + $0x48] sm:$0xff] }
  0x46   :  { %1581 = vmatpush.msra.mxu2 %v286_v8  ;;  %1582 = vmatpush.msra.mxu3 %v286_v8  ;;  %v463_v2 = vld [vmem:[#allocation13 + $0xb0] sm:$0xff]  ;;  %v464_v3 = vld [vmem:[#allocation13 + $0xb8] sm:$0xff]  ;;  %v461_v4 = vld [vmem:[#allocation13 + $0xa0] sm:$0xff] }
  0x47   :  { %303 = vmatpush.msra.mxu0 %v286_v8  ;;  %1580 = vmatpush.msra.mxu1 %v286_v8  ;;  %v462_v5 = vld [vmem:[#allocation13 + $0xa8] sm:$0xff]  ;;  %v459_v6 = vld [vmem:[#allocation13 + $0x90] sm:$0xff]  ;;  %v460_v7 = vld [vmem:[#allocation13 + $0x98] sm:$0xff] }
  0x48   :  { %1584 = vmatpush.msra.mxu2 %v285_v9  ;;  %1585 = vmatpush.msra.mxu3 %v285_v9  ;;  %v457_v8 = vld [vmem:[#allocation13 + $0x80] sm:$0xff] }
  0x49   :  { %304 = vmatpush.msra.mxu0 %v285_v9  ;;  %1583 = vmatpush.msra.mxu1 %v285_v9  ;;  %v458_v9 = vld [vmem:[#allocation13 + $0x88] sm:$0xff] }
  0x4a   :  { %1587 = vmatpush.msra.mxu2 %v284_v10  ;;  %1588 = vmatpush.msra.mxu3 %v284_v10 }
  0x4b   :  { %305 = vmatpush.msra.mxu0 %v284_v10  ;;  %1586 = vmatpush.msra.mxu1 %v284_v10  ;;  %v257_v10 = vld [vmem:[#allocation5 + $0x50] sm:$0xff] }
  0x4c   :  { %1590 = vmatpush.msra.mxu2 %v283_v11  ;;  %1591 = vmatpush.msra.mxu3 %v283_v11 }
  0x4d   :  { %306 = vmatpush.msra.mxu0 %v283_v11  ;;  %1589 = vmatpush.msra.mxu1 %v283_v11  ;;  %v455_v11 = vld [vmem:[#allocation13 + $0x70] sm:$0xff] }
  0x4e   :  { %1593 = vmatpush.msra.mxu2 %v282_v12  ;;  %1594 = vmatpush.msra.mxu3 %v282_v12 }
  0x4f   :  { %307 = vmatpush.msra.mxu0 %v282_v12  ;;  %1592 = vmatpush.msra.mxu1 %v282_v12  ;;  %v456_v12 = vld [vmem:[#allocation13 + $0x78] sm:$0xff] }
  0x50   :  { %1596 = vmatpush.msra.mxu2 %v281_v13  ;;  %1597 = vmatpush.msra.mxu3 %v281_v13 }
  0x51   :  { %308 = vmatpush.msra.mxu0 %v281_v13  ;;  %1595 = vmatpush.msra.mxu1 %v281_v13  ;;  %v453_v13 = vld [vmem:[#allocation13 + $0x60] sm:$0xff] }
  0x52   :  { %1599 = vmatpush.msra.mxu2 %v280_v14  ;;  %1600 = vmatpush.msra.mxu3 %v280_v14 }
  0x53   :  { %309 = vmatpush.msra.mxu0 %v280_v14  ;;  %1598 = vmatpush.msra.mxu1 %v280_v14  ;;  %v454_v14 = vld [vmem:[#allocation13 + $0x68] sm:$0xff] }
  0x54   :  { %1602 = vmatpush.msra.mxu2 %v279_v15  ;;  %1603 = vmatpush.msra.mxu3 %v279_v15 }
  0x55   :  { %332 = vmatmul.f32.vlgmr.msra.gmra.mxu2 %v270_v16  ;;  %347 = vmatmul.f32.vlgmr.msra.gmra.mxu3 %v275_v17  ;;  %v452_v16 = vld [vmem:[#allocation13 + $0x58] sm:$0xff]  ;;  %v449_v17 = vld [vmem:[#allocation13 + $0x40] sm:$0xff] }
  0x56   :  { %310 = vmatpush.msra.mxu0 %v279_v15  ;;  %1601 = vmatpush.msra.mxu1 %v279_v15  ;;  %v451_v15 = vld [vmem:[#allocation13 + $0x50] sm:$0xff] }
  0x57   :  { %311 = vmatmul.f32.vlgmr.msra.gmra.mxu0 %v263_v18  ;;  %326 = vmatmul.f32.vlgmr.msra.gmra.mxu1 %v268_v19  ;;  %v450_v18 = vld [vmem:[#allocation13 + $0x48] sm:$0xff]  ;;  %v258_v19 = vld [vmem:[#allocation5 + $0x58] sm:$0xff] }
  0x58   :  { %473 = vmatpush.msrb.mxu2 %v471_v57  ;;  %538 = vmatpush.msrb.mxu3 %v472_v58  ;;  %v839_v57 = vld [vmem:[#allocation16 + $0x50] sm:$0xff]  ;;  %v838_v58 = vld [vmem:[#allocation16 + $0x48] sm:$0xff] }
  0x5a   :  { %474 = vmatpush.msrb.mxu2 %v469_v59  ;;  %539 = vmatpush.msrb.mxu3 %v470_v60  ;;  %v837_v60 = vld [vmem:[#allocation16 + $0x40] sm:$0xff] }
  0x5c   :  { %475 = vmatpush.msrb.mxu2 %v467_v61  ;;  %540 = vmatpush.msrb.mxu3 %v468_v62  ;;  %v836_v62 = vld [vmem:[#allocation16 + $0x38] sm:$0xff] }
  0x5d   :  { %335 = vmatmul.f32.gmra.mxu2 %v271_v20  ;;  %350 = vmatmul.f32.gmra.mxu3 %v276_v21  ;;  %v447_v20 = vld [vmem:[#allocation13 + $0x30] sm:$0xff]  ;;  %v448_v21 = vld [vmem:[#allocation13 + $0x38] sm:$0xff] }
  0x5e   :  { %476 = vmatpush.msrb.mxu2 %v465_v63  ;;  %541 = vmatpush.msrb.mxu3 %v466_v0  ;;  %v835_v63 = vld [vmem:[#allocation16 + $0x30] sm:$0xff]  ;;  %v834_v0 = vld [vmem:[#allocation16 + $0x28] sm:$0xff] }
  0x5f   :  { %314 = vmatmul.f32.gmra.mxu0 %v264_v22  ;;  %329 = vmatmul.f32.gmra.mxu1 %v269_v23  ;;  %v445_v22 = vld [vmem:[#allocation13 + $0x20] sm:$0xff]  ;;  %v446_v23 = vld [vmem:[#allocation13 + $0x28] sm:$0xff] }
  0x60   :  { %477 = vmatpush.msrb.mxu2 %v463_v2  ;;  %542 = vmatpush.msrb.mxu3 %v464_v3  ;;  %v833_v2 = vld [vmem:[#allocation16 + $0x20] sm:$0xff] }
  0x62   :  { %478 = vmatpush.msrb.mxu2 %v461_v4  ;;  %543 = vmatpush.msrb.mxu3 %v462_v5  ;;  %v832_v4 = vld [vmem:[#allocation16 + $0x18] sm:$0xff]  ;;  %v831_v5 = vld [vmem:[#allocation16 + $0x10] sm:$0xff] }
  0x64   :  { %479 = vmatpush.msrb.mxu2 %v459_v6  ;;  %544 = vmatpush.msrb.mxu3 %v460_v7  ;;  %v830_v6 = vld [vmem:[#allocation16 + $0x8] sm:$0xff]  ;;  %v829_v7 = vld [vmem:[#allocation16] sm:$0xff] }
  0x65   :  { %338 = vmatmul.f32.gmra.mxu2 %v272_v24  ;;  %353 = vmatmul.f32.gmra.mxu3 %v277_v25  ;;  %v443_v24 = vld [vmem:[#allocation13 + $0x10] sm:$0xff]  ;;  %v444_v25 = vld [vmem:[#allocation13 + $0x18] sm:$0xff] }
  0x66   :  { %480 = vmatpush.msrb.mxu2 %v457_v8  ;;  %545 = vmatpush.msrb.mxu3 %v458_v9 }
  0x67   :  { %317 = vmatmul.f32.gmra.mxu0 %v265_v26  ;;  %v259_v26 = vld [vmem:[#allocation5 + $0x60] sm:$0xff] }
  0x68   :  { %481 = vmatpush.msrb.mxu2 %v455_v11  ;;  %546 = vmatpush.msrb.mxu3 %v456_v12 }
  0x6a   :  { %482 = vmatpush.msrb.mxu2 %v453_v13  ;;  %547 = vmatpush.msrb.mxu3 %v454_v14 }
  0x6c   :  { %483 = vmatpush.msrb.mxu2 %v451_v15  ;;  %548 = vmatpush.msrb.mxu3 %v452_v16  ;;  %v813_v16 = vld [vmem:[#allocation10] sm:$0xff] }
  0x6d   :  { %341 = vmatmul.f32.gmra.mxu2 %v273_v27  ;;  %356 = vmatmul.f32.gmra.mxu3 %v278_v28  ;;  %v441_v27 = vld [vmem:[#allocation13] sm:$0xff]  ;;  %v442_v28 = vld [vmem:[#allocation13 + $0x8] sm:$0xff] }
  0x6e   :  { %484 = vmatpush.msrb.mxu2 %v449_v17  ;;  %549 = vmatpush.msrb.mxu3 %v450_v18 }
  0x6f   :  { %320 = vmatmul.f32.gmra.mxu0 %v266_v29  ;;  %v260_v29 = vld [vmem:[#allocation5 + $0x68] sm:$0xff] }
  0x70   :  { %485 = vmatpush.msrb.mxu2 %v447_v20  ;;  %550 = vmatpush.msrb.mxu3 %v448_v21 }
  0x72   :  { %486 = vmatpush.msrb.mxu2 %v445_v22  ;;  %551 = vmatpush.msrb.mxu3 %v446_v23  ;;  %v815_v22 = vld [vmem:[#allocation10 + $0x10] sm:$0xff] }
  0x74   :  { %487 = vmatpush.msrb.mxu2 %v443_v24  ;;  %552 = vmatpush.msrb.mxu3 %v444_v25  ;;  %v816_v25 = vld [vmem:[#allocation10 + $0x18] sm:$0xff] }
  0x75   :  { %344 = vmatmul.f32.gmra.mxu2 %v274_v30  ;;  %v261_v30 = vld [vmem:[#allocation5 + $0x70] sm:$0xff] }
  0x76   :  { %488 = vmatpush.msrb.mxu2 %v441_v27  ;;  %553 = vmatpush.msrb.mxu3 %v442_v28  ;;  %v817_v28 = vld [vmem:[#allocation10 + $0x20] sm:$0xff] }
  0x77   :  { %323 = vmatmul.f32.gmra.mxu0 %v267_v31  ;;  %v262_v31 = vld [vmem:[#allocation5 + $0x78] sm:$0xff] }
  0xd4   :  { %v312_v34 = vpop.f32.mrf.mxu0  ;;  %v327_v43 = vpop.f32.mrf.mxu1 }
  0xd8   :  { %v333_v32 = vpop.f32.mrf.mxu2  ;;  %v348_v33 = vpop.f32.mrf.mxu3 }
  0xdc   :  { %v315_v37 = vpop.f32.mrf.mxu0  ;;  %v330_v46 = vpop.f32.mrf.mxu1 }
  0xe0   :  { %v336_v35 = vpop.f32.mrf.mxu2  ;;  %v351_v36 = vpop.f32.mrf.mxu3 }
  0xe4   :  { %v318_v40 = vpop.f32.mrf.mxu0 }
  0xe8   :  { %v339_v38 = vpop.f32.mrf.mxu2  ;;  %v354_v39 = vpop.f32.mrf.mxu3 }
  0xec   :  { %v321_v45 = vpop.f32.mrf.mxu0 }
  0xf0   :  { %v342_v41 = vpop.f32.mrf.mxu2  ;;  %v357_v42 = vpop.f32.mrf.mxu3 }
  0xf1   :  { %360 = vmatpush.msrb.mxu1 %v357_v42 }
  0xf3   :  { %361 = vmatpush.msrb.mxu1 %v354_v39 }
  0xf4   :  { %v324_v47 = vpop.f32.mrf.mxu0 }
  0xf5   :  { %362 = vmatpush.msrb.mxu1 %v351_v36 }
  0xf7   :  { %363 = vmatpush.msrb.mxu1 %v348_v33 }
  0xf8   :  { %v345_v44 = vpop.f32.mrf.mxu2 }
  0xf9   :  { %364 = vmatpush.msrb.mxu1 %v345_v44 }
  0xfb   :  { %365 = vmatpush.msrb.mxu1 %v342_v41 }
  0xfd   :  { %366 = vmatpush.msrb.mxu1 %v339_v38 }
  0xff   :  { %367 = vmatpush.msrb.mxu1 %v336_v35 }
 0x101   :  { %368 = vmatpush.msrb.mxu1 %v333_v32 }
 0x103   :  { %369 = vmatpush.msrb.mxu1 %v330_v46 }
 0x105   :  { %370 = vmatpush.msrb.mxu1 %v327_v43 }
 0x107   :  { %371 = vmatpush.msrb.mxu1 %v324_v47 }
 0x109   :  { %372 = vmatpush.msrb.mxu1 %v321_v45 }
 0x10b   :  { %373 = vmatpush.msrb.mxu1 %v318_v40 }
 0x10d   :  { %374 = vmatpush.msrb.mxu1 %v315_v37 }
 0x10f   :  { %375 = vmatpush.msrb.mxu1 %v312_v34 }
 0x110   :  { %376 = vmatmul.f32.vlgmr.msrb.gmra.mxu1 %v247_v48 }
 0x118   :  { %379 = vmatmul.f32.gmra.mxu1 %v248_v49 }
 0x120   :  { %382 = vmatmul.f32.gmra.mxu1 %v249_v50  ;;  %v844_v50 = vld [vmem:[#allocation16 + $0x78] sm:$0xff] }
 0x121   :  { %845 = vmatpush.msra.mxu2 %v844_v50 }
 0x128   :  { %385 = vmatmul.f32.gmra.mxu1 %v250_v51  ;;  %v843_v51 = vld [vmem:[#allocation16 + $0x70] sm:$0xff] }
 0x129   :  { %846 = vmatpush.msra.mxu2 %v843_v51 }
 0x130   :  { %388 = vmatmul.f32.gmra.mxu1 %v251_v52  ;;  %v842_v52 = vld [vmem:[#allocation16 + $0x68] sm:$0xff] }
 0x131   :  { %847 = vmatpush.msra.mxu2 %v842_v52  ;;  %v825_v52 = vld [vmem:[#allocation10 + $0x60] sm:$0xff] }
 0x138   :  { %391 = vmatmul.f32.gmra.mxu1 %v252_v53 }
 0x140   :  { %394 = vmatmul.f32.gmra.mxu1 %v253_v54  ;;  %v841_v54 = vld [vmem:[#allocation16 + $0x60] sm:$0xff] }
 0x141   :  { %848 = vmatpush.msra.mxu2 %v841_v54 }
 0x148   :  { %397 = vmatmul.f32.gmra.mxu1 %v254_v55 }
 0x150   :  { %400 = vmatmul.f32.gmra.mxu1 %v255_v56  ;;  %v840_v56 = vld [vmem:[#allocation16 + $0x58] sm:$0xff] }
 0x151   :  { %849 = vmatpush.msra.mxu2 %v840_v56 }
 0x153   :  { %850 = vmatpush.msra.mxu2 %v839_v57 }
 0x155   :  { %851 = vmatpush.msra.mxu2 %v838_v58  ;;  %v827_v58 = vld [vmem:[#allocation10 + $0x70] sm:$0xff] }
 0x157   :  { %852 = vmatpush.msra.mxu2 %v837_v60 }
 0x158   :  { %403 = vmatmul.f32.gmra.mxu1 %v256_v1 }
 0x159   :  { %853 = vmatpush.msra.mxu2 %v836_v62 }
 0x15b   :  { %854 = vmatpush.msra.mxu2 %v835_v63 }
 0x15d   :  { %855 = vmatpush.msra.mxu2 %v834_v0 }
 0x15f   :  { %856 = vmatpush.msra.mxu2 %v833_v2 }
 0x160   :  { %406 = vmatmul.f32.gmra.mxu1 %v257_v10 }
 0x161   :  { %857 = vmatpush.msra.mxu2 %v832_v4 }
 0x163   :  { %858 = vmatpush.msra.mxu2 %v831_v5 }
 0x165   :  { %859 = vmatpush.msra.mxu2 %v830_v6 }
 0x167   :  { %860 = vmatpush.msra.mxu2 %v829_v7 }
 0x168   :  { %409 = vmatmul.f32.gmra.mxu1 %v258_v19  ;;  %v814_v19 = vld [vmem:[#allocation10 + $0x8] sm:$0xff] }
 0x170   :  { %412 = vmatmul.f32.gmra.mxu1 %v259_v26 }
 0x178   :  { %415 = vmatmul.f32.gmra.mxu1 %v260_v29 }
 0x180   :  { %418 = vmatmul.f32.gmra.mxu1 %v261_v30 }
 0x188   :  { %421 = vmatmul.f32.gmra.mxu1 %v262_v31  ;;  %v818_v31 = vld [vmem:[#allocation10 + $0x28] sm:$0xff] }
 0x18d   :  { %v377_v32 = vpop.f32.mrf.mxu1 }
 0x18e   :  { %v425_v33 = vmax.f32 %v377_v32, 0.0 }
 0x190   :  { %489 = vmatmul.f32.vlgmr.msrb.gmra.mxu2 %v425_v33  ;;  %554 = vmatmul.f32.vlgmr.msrb.gmra.mxu3 %v425_v33 }
 0x195   :  { %v380_v34 = vpop.f32.mrf.mxu1 }
 0x196   :  { %v426_v35 = vmax.f32 %v380_v34, 0.0  ;;  %v819_v34 = vld [vmem:[#allocation10 + $0x30] sm:$0xff] }
 0x198   :  { %492 = vmatmul.f32.gmra.mxu2 %v426_v35  ;;  %557 = vmatmul.f32.gmra.mxu3 %v426_v35 }
 0x19d   :  { %v383_v36 = vpop.f32.mrf.mxu1 }
 0x19e   :  { %v427_v37 = vmax.f32 %v383_v36, 0.0 }
 0x1a0   :  { %495 = vmatmul.f32.gmra.mxu2 %v427_v37  ;;  %560 = vmatmul.f32.gmra.mxu3 %v427_v37  ;;  %v820_v37 = vld [vmem:[#allocation10 + $0x38] sm:$0xff] }
 0x1a5   :  { %v386_v38 = vpop.f32.mrf.mxu1 }
 0x1a6   :  { %v428_v39 = vmax.f32 %v386_v38, 0.0 }
 0x1a8   :  { %498 = vmatmul.f32.gmra.mxu2 %v428_v39  ;;  %563 = vmatmul.f32.gmra.mxu3 %v428_v39 }
 0x1ad   :  { %v389_v40 = vpop.f32.mrf.mxu1 }
 0x1ae   :  { %v429_v41 = vmax.f32 %v389_v40, 0.0  ;;  %v821_v40 = vld [vmem:[#allocation10 + $0x40] sm:$0xff] }
 0x1b0   :  { %501 = vmatmul.f32.gmra.mxu2 %v429_v41  ;;  %566 = vmatmul.f32.gmra.mxu3 %v429_v41 }
 0x1b5   :  { %v392_v42 = vpop.f32.mrf.mxu1 }
 0x1b6   :  { %v430_v43 = vmax.f32 %v392_v42, 0.0 }
 0x1b8   :  { %504 = vmatmul.f32.gmra.mxu2 %v430_v43  ;;  %569 = vmatmul.f32.gmra.mxu3 %v430_v43  ;;  %v822_v43 = vld [vmem:[#allocation10 + $0x48] sm:$0xff] }
 0x1bd   :  { %v395_v44 = vpop.f32.mrf.mxu1 }
 0x1be   :  { %v431_v45 = vmax.f32 %v395_v44, 0.0 }
 0x1c0   :  { %507 = vmatmul.f32.gmra.mxu2 %v431_v45  ;;  %572 = vmatmul.f32.gmra.mxu3 %v431_v45 }
 0x1c5   :  { %v398_v46 = vpop.f32.mrf.mxu1 }
 0x1c6   :  { %v432_v47 = vmax.f32 %v398_v46, 0.0  ;;  %v823_v46 = vld [vmem:[#allocation10 + $0x50] sm:$0xff] }
 0x1c8   :  { %510 = vmatmul.f32.gmra.mxu2 %v432_v47  ;;  %575 = vmatmul.f32.gmra.mxu3 %v432_v47 }
 0x1cd   :  { %v401_v48 = vpop.f32.mrf.mxu1 }
 0x1ce   :  { %v433_v49 = vmax.f32 %v401_v48, 0.0 }
 0x1d0   :  { %513 = vmatmul.f32.gmra.mxu2 %v433_v49  ;;  %578 = vmatmul.f32.gmra.mxu3 %v433_v49  ;;  %v824_v49 = vld [vmem:[#allocation10 + $0x58] sm:$0xff] }
 0x1d5   :  { %v404_v53 = vpop.f32.mrf.mxu1 }
 0x1d6   :  { %v434_v55 = vmax.f32 %v404_v53, 0.0 }
 0x1d8   :  { %516 = vmatmul.f32.gmra.mxu2 %v434_v55  ;;  %581 = vmatmul.f32.gmra.mxu3 %v434_v55  ;;  %v826_v55 = vld [vmem:[#allocation10 + $0x68] sm:$0xff] }
 0x1dd   :  { %v407_v59 = vpop.f32.mrf.mxu1 }
 0x1de   :  { %v435_v61 = vmax.f32 %v407_v59, 0.0 }
 0x1e0   :  { %519 = vmatmul.f32.gmra.mxu2 %v435_v61  ;;  %584 = vmatmul.f32.gmra.mxu3 %v435_v61  ;;  %v828_v61 = vld [vmem:[#allocation10 + $0x78] sm:$0xff] }
 0x1e5   :  { %v410_v1 = vpop.f32.mrf.mxu1 }
 0x1e6   :  { %v436_v3 = vmax.f32 %v410_v1, 0.0 }
 0x1e8   :  { %522 = vmatmul.f32.gmra.mxu2 %v436_v3  ;;  %587 = vmatmul.f32.gmra.mxu3 %v436_v3 }
 0x1ed   :  { %v413_v8 = vpop.f32.mrf.mxu1 }
 0x1ee   :  { %v437_v9 = vmax.f32 %v413_v8, 0.0 }
 0x1f0   :  { %525 = vmatmul.f32.gmra.mxu2 %v437_v9  ;;  %590 = vmatmul.f32.gmra.mxu3 %v437_v9 }
 0x1f5   :  { %v416_v10 = vpop.f32.mrf.mxu1 }
 0x1f6   :  { %v438_v11 = vmax.f32 %v416_v10, 0.0 }
 0x1f8   :  { %528 = vmatmul.f32.gmra.mxu2 %v438_v11  ;;  %593 = vmatmul.f32.gmra.mxu3 %v438_v11 }
 0x1fd   :  { %v419_v12 = vpop.f32.mrf.mxu1 }
 0x1fe   :  { %v439_v13 = vmax.f32 %v419_v12, 0.0 }
 0x200   :  { %531 = vmatmul.f32.gmra.mxu2 %v439_v13  ;;  %596 = vmatmul.f32.gmra.mxu3 %v439_v13 }
 0x205   :  { %v422_v14 = vpop.f32.mrf.mxu1 }
 0x206   :  { %v440_v15 = vmax.f32 %v422_v14, 0.0 }
 0x208   :  { %534 = vmatmul.f32.gmra.mxu2 %v440_v15  ;;  %599 = vmatmul.f32.gmra.mxu3 %v440_v15  ;;  %v231_v15 = vld [vmem:[#allocation2] sm:$0xff] }
 0x210   :  { %861 = vmatmul.f32.vlgmr.msra.gmra.mxu2 %v813_v16 }
 0x213   :  { %v2244_v17 = vpop.f32.mrf.mxu2  ;;  %v2246_v18 = vpop.f32.mrf.mxu3 }
 0x218   :  { %864 = vmatmul.f32.gmra.mxu2 %v814_v19  ;;  %v234_v19 = vld [vmem:[#allocation2 + $0x18] sm:$0xff] }
 0x21b   :  { %v2248_v20 = vpop.f32.mrf.mxu2  ;;  %v2250_v21 = vpop.f32.mrf.mxu3 }
 0x220   :  { %867 = vmatmul.f32.gmra.mxu2 %v815_v22  ;;  %v237_v22 = vld [vmem:[#allocation2 + $0x30] sm:$0xff] }
 0x223   :  { %v2252_v23 = vpop.f32.mrf.mxu2  ;;  %v2254_v24 = vpop.f32.mrf.mxu3 }
 0x228   :  { %870 = vmatmul.f32.gmra.mxu2 %v816_v25  ;;  %v240_v25 = vld [vmem:[#allocation2 + $0x48] sm:$0xff] }
 0x22b   :  { %v2256_v26 = vpop.f32.mrf.mxu2  ;;  %v2258_v27 = vpop.f32.mrf.mxu3 }
 0x230   :  { %873 = vmatmul.f32.gmra.mxu2 %v817_v28  ;;  %v2283_v28 = vld [vmem:[#allocation2 + $0x60] sm:$0xff] }
 0x233   :  { %v2260_v29 = vpop.f32.mrf.mxu2  ;;  %v2262_v30 = vpop.f32.mrf.mxu3 }
 0x238   :  { %876 = vmatmul.f32.gmra.mxu2 %v818_v31  ;;  %v2287_v31 = vld [vmem:[#allocation2 + $0x68] sm:$0xff] }
 0x23b   :  { %v2264_v32 = vpop.f32.mrf.mxu2  ;;  %v2266_v33 = vpop.f32.mrf.mxu3 }
 0x240   :  { %879 = vmatmul.f32.gmra.mxu2 %v819_v34  ;;  %v1017_v34 = vld [vmem:[#allocation17 + $0xd0] sm:$0xff] }
 0x243   :  { %v508_v35 = vpop.f32.mrf.mxu2  ;;  %v573_v36 = vpop.f32.mrf.mxu3 }
 0x248   :  { %882 = vmatmul.f32.gmra.mxu2 %v820_v37  ;;  %v1016_v37 = vld [vmem:[#allocation17 + $0xc8] sm:$0xff] }
 0x24b   :  { %v511_v38 = vpop.f32.mrf.mxu2  ;;  %v576_v39 = vpop.f32.mrf.mxu3 }
 0x250   :  { %885 = vmatmul.f32.gmra.mxu2 %v821_v40  ;;  %v2291_v40 = vld [vmem:[#allocation2 + $0x70] sm:$0xff] }
 0x253   :  { %v514_v41 = vpop.f32.mrf.mxu2  ;;  %v579_v42 = vpop.f32.mrf.mxu3 }
 0x258   :  { %888 = vmatmul.f32.gmra.mxu2 %v822_v43  ;;  %v1009_v43 = vld [vmem:[#allocation17 + $0x90] sm:$0xff] }
 0x25b   :  { %v517_v44 = vpop.f32.mrf.mxu2  ;;  %v582_v45 = vpop.f32.mrf.mxu3 }
 0x260   :  { %891 = vmatmul.f32.gmra.mxu2 %v823_v46  ;;  %v1008_v46 = vld [vmem:[#allocation17 + $0x88] sm:$0xff] }
 0x263   :  { %v520_v47 = vpop.f32.mrf.mxu2  ;;  %v585_v48 = vpop.f32.mrf.mxu3 }
 0x268   :  { %894 = vmatmul.f32.gmra.mxu2 %v824_v49  ;;  %v246_v49 = vld [vmem:[#allocation2 + $0x78] sm:$0xff] }
 0x26b   :  { %v523_v50 = vpop.f32.mrf.mxu2  ;;  %v588_v51 = vpop.f32.mrf.mxu3 }
 0x270   :  { %897 = vmatmul.f32.gmra.mxu2 %v825_v52  ;;  %v1001_v52 = vld [vmem:[#allocation17 + $0x50] sm:$0xff] }
 0x273   :  { %v526_v53 = vpop.f32.mrf.mxu2  ;;  %v591_v54 = vpop.f32.mrf.mxu3 }
 0x278   :  { %900 = vmatmul.f32.gmra.mxu2 %v826_v55  ;;  %v1000_v55 = vld [vmem:[#allocation17 + $0x48] sm:$0xff] }
 0x27b   :  { %v529_v56 = vpop.f32.mrf.mxu2  ;;  %v594_v57 = vpop.f32.mrf.mxu3 }
 0x280   :  { %903 = vmatmul.f32.gmra.mxu2 %v827_v58 }
 0x283   :  { %v532_v59 = vpop.f32.mrf.mxu2  ;;  %v597_v60 = vpop.f32.mrf.mxu3 }
 0x288   :  { %906 = vmatmul.f32.gmra.mxu2 %v828_v61  ;;  %v996_v61 = vld [vmem:[#allocation17 + $0x28] sm:$0xff] }
 0x28b   :  { %v535_v62 = vpop.f32.mrf.mxu2  ;;  %v600_v63 = vpop.f32.mrf.mxu3 }
 0x28c   :  { %603 = vmatpush.msrb.mxu0 %v535_v62  ;;  %668 = vmatpush.msra.mxu1 %v600_v63  ;;  %v993_v63 = vld [vmem:[#allocation17 + $0x10] sm:$0xff] }
 0x28e   :  { %604 = vmatpush.msrb.mxu0 %v532_v59  ;;  %669 = vmatpush.msra.mxu1 %v597_v60  ;;  %v995_v60 = vld [vmem:[#allocation17 + $0x20] sm:$0xff] }
 0x290   :  { %605 = vmatpush.msrb.mxu0 %v529_v56  ;;  %670 = vmatpush.msra.mxu1 %v594_v57  ;;  %v997_v56 = vld [vmem:[#allocation17 + $0x30] sm:$0xff]  ;;  %v998_v57 = vld [vmem:[#allocation17 + $0x38] sm:$0xff] }
 0x292   :  { %606 = vmatpush.msrb.mxu0 %v526_v53  ;;  %671 = vmatpush.msra.mxu1 %v591_v54  ;;  %v1002_v53 = vld [vmem:[#allocation17 + $0x58] sm:$0xff]  ;;  %v999_v54 = vld [vmem:[#allocation17 + $0x40] sm:$0xff] }
 0x293   :  { %v2268_v0 = vpop.f32.mrf.mxu2 }
 0x294   :  { %607 = vmatpush.msrb.mxu0 %v523_v50  ;;  %672 = vmatpush.msra.mxu1 %v588_v51  ;;  %v1003_v50 = vld [vmem:[#allocation17 + $0x60] sm:$0xff]  ;;  %v1004_v51 = vld [vmem:[#allocation17 + $0x68] sm:$0xff] }
 0x296   :  { %608 = vmatpush.msrb.mxu0 %v520_v47  ;;  %673 = vmatpush.msra.mxu1 %v585_v48  ;;  %v1005_v47 = vld [vmem:[#allocation17 + $0x70] sm:$0xff]  ;;  %v1006_v48 = vld [vmem:[#allocation17 + $0x78] sm:$0xff] }
 0x298   :  { %609 = vmatpush.msrb.mxu0 %v517_v44  ;;  %674 = vmatpush.msra.mxu1 %v582_v45  ;;  %v1010_v44 = vld [vmem:[#allocation17 + $0x98] sm:$0xff]  ;;  %v1007_v45 = vld [vmem:[#allocation17 + $0x80] sm:$0xff] }
 0x29a   :  { %610 = vmatpush.msrb.mxu0 %v514_v41  ;;  %675 = vmatpush.msra.mxu1 %v579_v42  ;;  %v1011_v41 = vld [vmem:[#allocation17 + $0xa0] sm:$0xff]  ;;  %v1012_v42 = vld [vmem:[#allocation17 + $0xa8] sm:$0xff] }
 0x29b   :  { %v865_v1 = vpop.f32.mrf.mxu2 }
 0x29c   :  { %611 = vmatpush.msrb.mxu0 %v511_v38  ;;  %676 = vmatpush.msra.mxu1 %v576_v39  ;;  %v1013_v38 = vld [vmem:[#allocation17 + $0xb0] sm:$0xff]  ;;  %v1014_v39 = vld [vmem:[#allocation17 + $0xb8] sm:$0xff] }
 0x29e   :  { %612 = vmatpush.msrb.mxu0 %v508_v35  ;;  %677 = vmatpush.msra.mxu1 %v573_v36  ;;  %v1018_v35 = vld [vmem:[#allocation17 + $0xd8] sm:$0xff]  ;;  %v1015_v36 = vld [vmem:[#allocation17 + $0xc0] sm:$0xff] }
 0x2a0   :  { %613 = vmatpush.msrb.mxu0 %v2264_v32  ;;  %678 = vmatpush.msra.mxu1 %v2266_v33  ;;  %v1019_v32 = vld [vmem:[#allocation17 + $0xe0] sm:$0xff]  ;;  %v1020_v33 = vld [vmem:[#allocation17 + $0xe8] sm:$0xff] }
 0x2a2   :  { %614 = vmatpush.msrb.mxu0 %v2260_v29  ;;  %679 = vmatpush.msra.mxu1 %v2262_v30  ;;  %v1021_v29 = vld [vmem:[#allocation17 + $0xf0] sm:$0xff]  ;;  %v1022_v30 = vld [vmem:[#allocation17 + $0xf8] sm:$0xff] }
 0x2a3   :  { %v868_v2 = vpop.f32.mrf.mxu2 }
 0x2a4   :  { %615 = vmatpush.msrb.mxu0 %v2256_v26  ;;  %680 = vmatpush.msra.mxu1 %v2258_v27  ;;  %v241_v26 = vld [vmem:[#allocation2 + $0x50] sm:$0xff]  ;;  %v242_v27 = vld [vmem:[#allocation2 + $0x58] sm:$0xff] }
 0x2a6   :  { %616 = vmatpush.msrb.mxu0 %v2252_v23  ;;  %681 = vmatpush.msra.mxu1 %v2254_v24  ;;  %v238_v23 = vld [vmem:[#allocation2 + $0x38] sm:$0xff]  ;;  %v239_v24 = vld [vmem:[#allocation2 + $0x40] sm:$0xff] }
 0x2a8   :  { %617 = vmatpush.msrb.mxu0 %v2248_v20  ;;  %682 = vmatpush.msra.mxu1 %v2250_v21  ;;  %v235_v20 = vld [vmem:[#allocation2 + $0x20] sm:$0xff]  ;;  %v236_v21 = vld [vmem:[#allocation2 + $0x28] sm:$0xff] }
 0x2aa   :  { %618 = vmatpush.msrb.mxu0 %v2244_v17  ;;  %683 = vmatpush.msra.mxu1 %v2246_v18  ;;  %v232_v17 = vld [vmem:[#allocation2 + $0x8] sm:$0xff]  ;;  %v233_v18 = vld [vmem:[#allocation2 + $0x10] sm:$0xff] }
 0x2ab   :  { %v871_v3 = vpop.f32.mrf.mxu2  ;;  %619 = vmatmul.f32.vlgmr.msrb.gmra.mxu0 %v231_v15  ;;  %684 = vmatmul.f32.vlgmr.msra.gmra.mxu1 %v231_v15 }
 0x2ac   :  { %1023 = vmatpush.msra.mxu0 %v1021_v29  ;;  %1088 = vmatpush.msrb.mxu1 %v1022_v30  ;;  %v736_v30 = vld [vmem:[#allocation19 + $0x18] sm:$0xff] }
 0x2ae   :  { %1024 = vmatpush.msra.mxu0 %v1019_v32  ;;  %1089 = vmatpush.msrb.mxu1 %v1020_v33 }
 0x2b0   :  { %1025 = vmatpush.msra.mxu0 %v1017_v34  ;;  %1090 = vmatpush.msrb.mxu1 %v1018_v35 }
 0x2b2   :  { %1026 = vmatpush.msra.mxu0 %v1015_v36  ;;  %1091 = vmatpush.msrb.mxu1 %v1016_v37 }
 0x2b3   :  { %v874_v4 = vpop.f32.mrf.mxu2  ;;  %622 = vmatmul.f32.gmra.mxu0 %v232_v17  ;;  %687 = vmatmul.f32.gmra.mxu1 %v232_v17 }
 0x2b4   :  { %1027 = vmatpush.msra.mxu0 %v1013_v38  ;;  %1092 = vmatpush.msrb.mxu1 %v1014_v39  ;;  %v737_v39 = vld [vmem:[#allocation19 + $0x20] sm:$0xff] }
 0x2b6   :  { %1028 = vmatpush.msra.mxu0 %v1011_v41  ;;  %1093 = vmatpush.msrb.mxu1 %v1012_v42 }
 0x2b8   :  { %1029 = vmatpush.msra.mxu0 %v1009_v43  ;;  %1094 = vmatpush.msrb.mxu1 %v1010_v44 }
 0x2ba   :  { %1030 = vmatpush.msra.mxu0 %v1007_v45  ;;  %1095 = vmatpush.msrb.mxu1 %v1008_v46 }
 0x2bb   :  { %v877_v5 = vpop.f32.mrf.mxu2  ;;  %625 = vmatmul.f32.gmra.mxu0 %v233_v18  ;;  %690 = vmatmul.f32.gmra.mxu1 %v233_v18 }
 0x2bc   :  { %1031 = vmatpush.msra.mxu0 %v1005_v47  ;;  %1096 = vmatpush.msrb.mxu1 %v1006_v48  ;;  %v738_v48 = vld [vmem:[#allocation19 + $0x28] sm:$0xff] }
 0x2be   :  { %1032 = vmatpush.msra.mxu0 %v1003_v50  ;;  %1097 = vmatpush.msrb.mxu1 %v1004_v51 }
 0x2c0   :  { %1033 = vmatpush.msra.mxu0 %v1001_v52  ;;  %1098 = vmatpush.msrb.mxu1 %v1002_v53 }
 0x2c2   :  { %1034 = vmatpush.msra.mxu0 %v999_v54  ;;  %1099 = vmatpush.msrb.mxu1 %v1000_v55 }
 0x2c3   :  { %v880_v6 = vpop.f32.mrf.mxu2  ;;  %628 = vmatmul.f32.gmra.mxu0 %v234_v19  ;;  %693 = vmatmul.f32.gmra.mxu1 %v234_v19 }
 0x2c4   :  { %1035 = vmatpush.msra.mxu0 %v997_v56  ;;  %1100 = vmatpush.msrb.mxu1 %v998_v57  ;;  %v739_v57 = vld [vmem:[#allocation19 + $0x30] sm:$0xff] }
 0x2c6   :  { %1036 = vmatpush.msra.mxu0 %v995_v60  ;;  %1101 = vmatpush.msrb.mxu1 %v996_v61 }
 0x2c8   :  { %1037 = vmatpush.msra.mxu0 %v993_v63 }
 0x2cb   :  { %v883_v7 = vpop.f32.mrf.mxu2  ;;  %631 = vmatmul.f32.gmra.mxu0 %v235_v20  ;;  %696 = vmatmul.f32.gmra.mxu1 %v235_v20 }
 0x2d3   :  { %v886_v8 = vpop.f32.mrf.mxu2  ;;  %634 = vmatmul.f32.gmra.mxu0 %v236_v21  ;;  %699 = vmatmul.f32.gmra.mxu1 %v236_v21 }
 0x2db   :  { %v889_v9 = vpop.f32.mrf.mxu2  ;;  %637 = vmatmul.f32.gmra.mxu0 %v237_v22  ;;  %702 = vmatmul.f32.gmra.mxu1 %v237_v22 }
 0x2e3   :  { %v892_v10 = vpop.f32.mrf.mxu2  ;;  %640 = vmatmul.f32.gmra.mxu0 %v238_v23  ;;  %705 = vmatmul.f32.gmra.mxu1 %v238_v23 }
 0x2eb   :  { %v895_v11 = vpop.f32.mrf.mxu2  ;;  %643 = vmatmul.f32.gmra.mxu0 %v239_v24  ;;  %708 = vmatmul.f32.gmra.mxu1 %v239_v24 }
 0x2f3   :  { %v898_v12 = vpop.f32.mrf.mxu2  ;;  %646 = vmatmul.f32.gmra.mxu0 %v240_v25  ;;  %711 = vmatmul.f32.gmra.mxu1 %v240_v25 }
 0x2fb   :  { %v901_v13 = vpop.f32.mrf.mxu2  ;;  %649 = vmatmul.f32.gmra.mxu0 %v241_v26  ;;  %714 = vmatmul.f32.gmra.mxu1 %v241_v26 }
 0x303   :  { %v904_v14 = vpop.f32.mrf.mxu2  ;;  %652 = vmatmul.f32.gmra.mxu0 %v242_v27  ;;  %717 = vmatmul.f32.gmra.mxu1 %v242_v27 }
 0x30b   :  { %v907_v16 = vpop.f32.mrf.mxu2  ;;  %655 = vmatmul.f32.gmra.mxu0 %v2283_v28  ;;  %720 = vmatmul.f32.gmra.mxu1 %v2283_v28 }
 0x30c   :  { %910 = vmatpush.msra.mxu3 %v907_v16 }
 0x30e   :  { %911 = vmatpush.msra.mxu3 %v904_v14  ;;  %v734_v14 = vld [vmem:[#allocation19 + $0x8] sm:$0xff] }
 0x310   :  { %912 = vmatpush.msra.mxu3 %v901_v13 }
 0x312   :  { %913 = vmatpush.msra.mxu3 %v898_v12 }
 0x313   :  { %658 = vmatmul.f32.gmra.mxu0 %v2287_v31  ;;  %723 = vmatmul.f32.gmra.mxu1 %v2287_v31 }
 0x314   :  { %914 = vmatpush.msra.mxu3 %v895_v11 }
 0x316   :  { %915 = vmatpush.msra.mxu3 %v892_v10 }
 0x318   :  { %916 = vmatpush.msra.mxu3 %v889_v9 }
 0x31a   :  { %917 = vmatpush.msra.mxu3 %v886_v8 }
 0x31b   :  { %661 = vmatmul.f32.gmra.mxu0 %v2291_v40  ;;  %726 = vmatmul.f32.gmra.mxu1 %v2291_v40 }
 0x31c   :  { %918 = vmatpush.msra.mxu3 %v883_v7 }
 0x31e   :  { %919 = vmatpush.msra.mxu3 %v880_v6 }
 0x320   :  { %920 = vmatpush.msra.mxu3 %v877_v5 }
 0x322   :  { %921 = vmatpush.msra.mxu3 %v874_v4 }
 0x323   :  { %664 = vmatmul.f32.gmra.mxu0 %v246_v49  ;;  %729 = vmatmul.f32.gmra.mxu1 %v246_v49 }
 0x324   :  { %922 = vmatpush.msra.mxu3 %v871_v3  ;;  %v992_v3 = vld [vmem:[#allocation17 + $0x8] sm:$0xff] }
 0x326   :  { %923 = vmatpush.msra.mxu3 %v868_v2  ;;  %v991_v2 = vld [vmem:[#allocation17] sm:$0xff] }
 0x327   :  { %1038 = vmatpush.msra.mxu0 %v991_v2  ;;  %v740_v2 = vld [vmem:[#allocation19 + $0x38] sm:$0xff] }
 0x328   :  { %924 = vmatpush.msra.mxu3 %v865_v1  ;;  %v620_v58 = vpop.f32.mrf.mxu0  ;;  %v685_v59 = vpop.f32.mrf.mxu1  ;;  %v733_v1 = vld [vmem:[#allocation19] sm:$0xff] }
 0x329   :  { %v749_v62 = vmul.f32 1.442695, %v685_v59 }
 0x32a   :  { %925 = vmatpush.msra.mxu3 %v2268_v0  ;;  %v994_v0 = vld [vmem:[#allocation17 + $0x18] sm:$0xff] }
 0x32b   :  { %926 = vmatmul.f32.vlgmr.msra.gmra.mxu3 %v231_v15  ;;  %1623 = vpow2.f32 %v749_v62  ;;  %1102 = vmatpush.msrb.mxu1 %v994_v0 }
 0x32d   :  { %1103 = vmatpush.msrb.mxu1 %v992_v3 }
 0x330   :  { %v623_v5 = vpop.f32.mrf.mxu0  ;;  %v688_v6 = vpop.f32.mrf.mxu1 }
 0x331   :  { %v1624_v4 = vpop.eup %1623  ;;  %v751_v8 = vmul.f32 1.442695, %v688_v6 }
 0x332   :  { %v781_v7 = vmul.f32 %v1624_v4, %v733_v1 }
 0x333   :  { %929 = vmatmul.f32.gmra.mxu3 %v232_v17  ;;  %1625 = vpow2.f32 %v751_v8 }
 0x334   :  { %v2297_v9 = vadd.f32 %v781_v7, %v620_v58 }
 0x336   :  { %1465 = vst [vmem:[#allocation22] sm:$0xff] %v2297_v9 }
 0x338   :  { %v626_v10 = vpop.f32.mrf.mxu0  ;;  %v691_v11 = vpop.f32.mrf.mxu1 }
 0x339   :  { %v753_v12 = vmul.f32 1.442695, %v691_v11  ;;  %v1626_v13 = vpop.eup %1625 }
 0x33a   :  { %v782_v15 = vmul.f32 %v1626_v13, %v734_v14 }
 0x33b   :  { %932 = vmatmul.f32.gmra.mxu3 %v233_v18  ;;  %1627 = vpow2.f32 %v753_v12  ;;  %v741_v12 = vld [vmem:[#allocation19 + $0x40] sm:$0xff] }
 0x33c   :  { %v2301_v18 = vadd.f32 %v782_v15, %v623_v5 }
 0x33e   :  { %1466 = vst [vmem:[#allocation22 + $0x8] sm:$0xff] %v2301_v18 }
 0x340   :  { %v629_v16 = vpop.f32.mrf.mxu0  ;;  %v694_v17 = vpop.f32.mrf.mxu1 }
 0x343   :  { %935 = vmatmul.f32.gmra.mxu3 %v234_v19  ;;  %v755_v19 = vmul.f32 1.442695, %v694_v17 }
 0x345   :  { %1629 = vpow2.f32 %v755_v19 }
 0x34b   :  { %938 = vmatmul.f32.gmra.mxu3 %v235_v20  ;;  %v1628_v20 = vpop.eup %1627 }
 0x353   :  { %941 = vmatmul.f32.gmra.mxu3 %v236_v21  ;;  %v735_v21 = vld [vmem:[#allocation19 + $0x10] sm:$0xff] }
 0x35b   :  { %944 = vmatmul.f32.gmra.mxu3 %v237_v22  ;;  %v783_v22 = vmul.f32 %v1628_v20, %v735_v21 }
 0x363   :  { %947 = vmatmul.f32.gmra.mxu3 %v238_v23  ;;  %v632_v23 = vpop.f32.mrf.mxu0 }
 0x36b   :  { %950 = vmatmul.f32.gmra.mxu3 %v239_v24  ;;  %v697_v24 = vpop.f32.mrf.mxu1  ;;  %v635_v32 = vpop.f32.mrf.mxu0 }
 0x373   :  { %953 = vmatmul.f32.gmra.mxu3 %v240_v25  ;;  %v2304_v25 = vadd.f32 %v783_v22, %v626_v10  ;;  %v700_v33 = vpop.f32.mrf.mxu1  ;;  %v638_v41 = vpop.f32.mrf.mxu0  ;;  %v742_v22 = vld [vmem:[#allocation19 + $0x48] sm:$0xff] }
 0x374   :  { %v759_v35 = vmul.f32 1.442695, %v700_v33 }
 0x375   :  { %1467 = vst [vmem:[#allocation22 + $0x10] sm:$0xff] %v2304_v25 }
 0x37b   :  { %956 = vmatmul.f32.gmra.mxu3 %v241_v26  ;;  %v757_v26 = vmul.f32 1.442695, %v697_v24  ;;  %v703_v42 = vpop.f32.mrf.mxu1  ;;  %v641_v50 = vpop.f32.mrf.mxu0 }
 0x37c   :  { %v761_v44 = vmul.f32 1.442695, %v703_v42 }
 0x37d   :  { %1631 = vpow2.f32 %v757_v26 }
 0x37e   :  { %1633 = vpow2.f32 %v759_v35 }
 0x37f   :  { %1635 = vpow2.f32 %v761_v44  ;;  %v1379_v44 = vld [vmem:[#allocation14 + $0x78] sm:$0xff] }
 0x380   :  { %1380 = vmatpush.msrb.mxu0 %v1379_v44 }
 0x383   :  { %959 = vmatmul.f32.gmra.mxu3 %v242_v27  ;;  %v1630_v27 = vpop.eup %1629  ;;  %v706_v51 = vpop.f32.mrf.mxu1 }
 0x384   :  { %v1632_v36 = vpop.eup %1631  ;;  %v763_v53 = vmul.f32 1.442695, %v706_v51  ;;  %v644_v61 = vpop.f32.mrf.mxu0  ;;  %v1377_v51 = vld [vmem:[#allocation14 + $0x68] sm:$0xff] }
 0x385   :  { %v1634_v45 = vpop.eup %1633 }
 0x386   :  { %v1636_v54 = vpop.eup %1635  ;;  %1637 = vpow2.f32 %v763_v53 }
 0x387   :  { %v787_v58 = vmul.f32 %v1636_v54, %v739_v57 }
 0x389   :  { %v2316_v60 = vadd.f32 %v787_v58, %v638_v41  ;;  %v744_v41 = vld [vmem:[#allocation19 + $0x58] sm:$0xff] }
 0x38a   :  { %v1375_v58 = vld [vmem:[#allocation14 + $0x58] sm:$0xff] }
 0x38b   :  { %962 = vmatmul.f32.gmra.mxu3 %v2283_v28  ;;  %v709_v59 = vpop.f32.mrf.mxu1  ;;  %1471 = vst [vmem:[#allocation22 + $0x30] sm:$0xff] %v2316_v60 }
 0x38c   :  { %v765_v62 = vmul.f32 1.442695, %v709_v59  ;;  %v1638_v63 = vpop.eup %1637  ;;  %v647_v8 = vpop.f32.mrf.mxu0  ;;  %v1374_v59 = vld [vmem:[#allocation14 + $0x50] sm:$0xff] }
 0x38d   :  { %v788_v3 = vmul.f32 %v1638_v63, %v740_v2  ;;  %v1373_v2 = vld [vmem:[#allocation14 + $0x48] sm:$0xff] }
 0x38e   :  { %1639 = vpow2.f32 %v765_v62 }
 0x38f   :  { %v2319_v5 = vadd.f32 %v788_v3, %v641_v50 }
 0x391   :  { %1472 = vst [vmem:[#allocation22 + $0x38] sm:$0xff] %v2319_v5 }
 0x393   :  { %965 = vmatmul.f32.gmra.mxu3 %v2287_v31  ;;  %v784_v31 = vmul.f32 %v1630_v27, %v736_v30  ;;  %v712_v4 = vpop.f32.mrf.mxu1 }
 0x394   :  { %v767_v6 = vmul.f32 1.442695, %v712_v4  ;;  %v1640_v7 = vpop.eup %1639  ;;  %v650_v21 = vpop.f32.mrf.mxu0 }
 0x395   :  { %v2307_v34 = vadd.f32 %v784_v31, %v629_v16  ;;  %v789_v13 = vmul.f32 %v1640_v7, %v741_v12  ;;  %v743_v31 = vld [vmem:[#allocation19 + $0x50] sm:$0xff]  ;;  %v746_v7 = vld [vmem:[#allocation19 + $0x68] sm:$0xff] }
 0x396   :  { %1641 = vpow2.f32 %v767_v6  ;;  %v1372_v6 = vld [vmem:[#allocation14 + $0x40] sm:$0xff] }
 0x397   :  { %1468 = vst [vmem:[#allocation22 + $0x18] sm:$0xff] %v2307_v34  ;;  %v2322_v15 = vadd.f32 %v789_v13, %v644_v61 }
 0x399   :  { %1473 = vst [vmem:[#allocation22 + $0x40] sm:$0xff] %v2322_v15 }
 0x39b   :  { %968 = vmatmul.f32.gmra.mxu3 %v2291_v40  ;;  %v785_v40 = vmul.f32 %v1632_v36, %v737_v39  ;;  %v715_v14 = vpop.f32.mrf.mxu1 }
 0x39c   :  { %v769_v16 = vmul.f32 1.442695, %v715_v14  ;;  %v1642_v17 = vpop.eup %1641  ;;  %v653_v33 = vpop.f32.mrf.mxu0 }
 0x39d   :  { %v2310_v43 = vadd.f32 %v785_v40, %v632_v23  ;;  %v790_v23 = vmul.f32 %v1642_v17, %v742_v22  ;;  %v1369_v17 = vld [vmem:[#allocation14 + $0x28] sm:$0xff]  ;;  %v1368_v22 = vld [vmem:[#allocation14 + $0x20] sm:$0xff] }
 0x39e   :  { %1643 = vpow2.f32 %v769_v16 }
 0x39f   :  { %1469 = vst [vmem:[#allocation22 + $0x20] sm:$0xff] %v2310_v43  ;;  %v2325_v26 = vadd.f32 %v790_v23, %v647_v8  ;;  %v747_v23 = vld [vmem:[#allocation19 + $0x70] sm:$0xff] }
 0x3a1   :  { %1474 = vst [vmem:[#allocation22 + $0x48] sm:$0xff] %v2325_v26 }
 0x3a3   :  { %971 = vmatmul.f32.gmra.mxu3 %v246_v49  ;;  %v786_v49 = vmul.f32 %v1634_v45, %v738_v48  ;;  %v718_v24 = vpop.f32.mrf.mxu1  ;;  %v1378_v45 = vld [vmem:[#allocation14 + $0x70] sm:$0xff] }
 0x3a4   :  { %v771_v27 = vmul.f32 1.442695, %v718_v24  ;;  %v656_v48 = vpop.f32.mrf.mxu0  ;;  %1381 = vmatpush.msrb.mxu0 %v1378_v45 }
 0x3a5   :  { %v2313_v52 = vadd.f32 %v786_v49, %v635_v32 }
 0x3a6   :  { %1645 = vpow2.f32 %v771_v27  ;;  %1382 = vmatpush.msrb.mxu0 %v1377_v51  ;;  %v1367_v27 = vld [vmem:[#allocation14 + $0x18] sm:$0xff] }
 0x3a7   :  { %1470 = vst [vmem:[#allocation22 + $0x28] sm:$0xff] %v2313_v52 }
 0x3ab   :  { %v721_v35 = vpop.f32.mrf.mxu1 }
 0x3ae   :  { %v927_v28 = vpop.f32.mrf.mxu3 }
 0x3af   :  { %v975_v29 = vmax.f32 %v927_v28, 0.0  ;;  %v1644_v28 = vpop.eup %1643 }
 0x3b0   :  { %v791_v32 = vmul.f32 %v1644_v28, %v743_v31  ;;  %v1366_v28 = vld [vmem:[#allocation14 + $0x10] sm:$0xff]  ;;  %v1365_v31 = vld [vmem:[#allocation14 + $0x8] sm:$0xff] }
 0x3b1   :  { %1039 = vmatmul.f32.vlgmr.msra.gmra.mxu0 %v975_v29  ;;  %1104 = vmatmul.f32.vlgmr.msrb.gmra.mxu1 %v975_v29 }
 0x3b2   :  { %v2328_v36 = vadd.f32 %v791_v32, %v650_v21 }
 0x3b4   :  { %1475 = vst [vmem:[#allocation22 + $0x50] sm:$0xff] %v2328_v36 }
 0x3b6   :  { %v930_v37 = vpop.f32.mrf.mxu3 }
 0x3b7   :  { %v976_v38 = vmax.f32 %v930_v37, 0.0  ;;  %v773_v37 = vmul.f32 1.442695, %v721_v35 }
 0x3b9   :  { %1042 = vmatmul.f32.gmra.mxu0 %v976_v38  ;;  %1107 = vmatmul.f32.gmra.mxu1 %v976_v38  ;;  %v1646_v38 = vpop.eup %1645  ;;  %1647 = vpow2.f32 %v773_v37  ;;  %v748_v37 = vld [vmem:[#allocation19 + $0x78] sm:$0xff] }
 0x3ba   :  { %v792_v42 = vmul.f32 %v1646_v38, %v744_v41 }
 0x3be   :  { %v933_v46 = vpop.f32.mrf.mxu3 }
 0x3bf   :  { %v977_v47 = vmax.f32 %v933_v46, 0.0  ;;  %v724_v46 = vpop.f32.mrf.mxu1  ;;  %v1648_v50 = vpop.eup %1647 }
 0x3c0   :  { %v775_v49 = vmul.f32 1.442695, %v724_v46 }
 0x3c1   :  { %1045 = vmatmul.f32.gmra.mxu0 %v977_v47  ;;  %1110 = vmatmul.f32.gmra.mxu1 %v977_v47  ;;  %v2331_v47 = vadd.f32 %v792_v42, %v653_v33  ;;  %v1364_v33 = vld [vmem:[#allocation14] sm:$0xff] }
 0x3c2   :  { %1649 = vpow2.f32 %v775_v49 }
 0x3c3   :  { %1476 = vst [vmem:[#allocation22 + $0x58] sm:$0xff] %v2331_v47 }
 0x3c6   :  { %v936_v55 = vpop.f32.mrf.mxu3 }
 0x3c7   :  { %v978_v56 = vmax.f32 %v936_v55, 0.0  ;;  %v1376_v55 = vld [vmem:[#allocation14 + $0x60] sm:$0xff]  ;;  %v727_v61 = vpop.f32.mrf.mxu1 }
 0x3c8   :  { %1383 = vmatpush.msrb.mxu0 %v1376_v55  ;;  %v777_v63 = vmul.f32 1.442695, %v727_v61 }
 0x3c9   :  { %1048 = vmatmul.f32.gmra.mxu0 %v978_v56  ;;  %1113 = vmatmul.f32.gmra.mxu1 %v978_v56  ;;  %v745_v56 = vld [vmem:[#allocation19 + $0x60] sm:$0xff] }
 0x3ca   :  { %v793_v57 = vmul.f32 %v1648_v50, %v745_v56  ;;  %1384 = vmatpush.msrb.mxu0 %v1375_v58  ;;  %1651 = vpow2.f32 %v777_v63 }
 0x3cc   :  { %v2334_v62 = vadd.f32 %v793_v57, %v656_v48  ;;  %1385 = vmatpush.msrb.mxu0 %v1374_v59 }
 0x3ce   :  { %v939_v0 = vpop.f32.mrf.mxu3  ;;  %1477 = vst [vmem:[#allocation22 + $0x60] sm:$0xff] %v2334_v62  ;;  %1386 = vmatpush.msrb.mxu0 %v1373_v2 }
 0x3cf   :  { %v979_v1 = vmax.f32 %v939_v0, 0.0  ;;  %v1650_v0 = vpop.eup %1649  ;;  %v730_v12 = vpop.f32.mrf.mxu1 }
 0x3d0   :  { %1387 = vmatpush.msrb.mxu0 %v1372_v6  ;;  %v794_v8 = vmul.f32 %v1650_v0, %v746_v7  ;;  %v779_v14 = vmul.f32 1.442695, %v730_v12  ;;  %v1652_v16 = vpop.eup %1651 }
 0x3d1   :  { %1051 = vmatmul.f32.gmra.mxu0 %v979_v1  ;;  %1116 = vmatmul.f32.gmra.mxu1 %v979_v1  ;;  %v659_v1 = vpop.f32.mrf.mxu0  ;;  %v795_v24 = vmul.f32 %v1652_v16, %v747_v23  ;;  %v1688_v16 = vld [vmem:[#allocation5 + $0x8] sm:$0xff]  ;;  %v1691_v23 = vld [vmem:[#allocation5 + $0x20] sm:$0xff] }
 0x3d2   :  { %v2337_v13 = vadd.f32 %v794_v8, %v659_v1  ;;  %1653 = vpow2.f32 %v779_v14 }
 0x3d4   :  { %1478 = vst [vmem:[#allocation22 + $0x68] sm:$0xff] %v2337_v13 }
 0x3d6   :  { %v942_v10 = vpop.f32.mrf.mxu3 }
 0x3d7   :  { %v980_v11 = vmax.f32 %v942_v10, 0.0  ;;  %v1371_v10 = vld [vmem:[#allocation14 + $0x38] sm:$0xff] }
 0x3d8   :  { %1388 = vmatpush.msrb.mxu0 %v1371_v10 }
 0x3d9   :  { %1054 = vmatmul.f32.gmra.mxu0 %v980_v11  ;;  %1119 = vmatmul.f32.gmra.mxu1 %v980_v11  ;;  %v1370_v11 = vld [vmem:[#allocation14 + $0x30] sm:$0xff]  ;;  %v662_v21 = vpop.f32.mrf.mxu0 }
 0x3da   :  { %1389 = vmatpush.msrb.mxu0 %v1370_v11 }
 0x3dc   :  { %1390 = vmatpush.msrb.mxu0 %v1369_v17 }
 0x3de   :  { %v945_v19 = vpop.f32.mrf.mxu3  ;;  %1391 = vmatpush.msrb.mxu0 %v1368_v22 }
 0x3df   :  { %v981_v20 = vmax.f32 %v945_v19, 0.0 }
 0x3e0   :  { %1392 = vmatpush.msrb.mxu0 %v1367_v27  ;;  %v1692_v27 = vld [vmem:[#allocation5 + $0x28] sm:$0xff] }
 0x3e1   :  { %1057 = vmatmul.f32.gmra.mxu0 %v981_v20  ;;  %1122 = vmatmul.f32.gmra.mxu1 %v981_v20 }
 0x3e2   :  { %1393 = vmatpush.msrb.mxu0 %v1366_v28 }
 0x3e4   :  { %1394 = vmatpush.msrb.mxu0 %v1365_v31  ;;  %v1694_v31 = vld [vmem:[#allocation5 + $0x38] sm:$0xff] }
 0x3e6   :  { %v948_v29 = vpop.f32.mrf.mxu3  ;;  %1395 = vmatpush.msrb.mxu0 %v1364_v33  ;;  %v1695_v33 = vld [vmem:[#allocation5 + $0x40] sm:$0xff] }
 0x3e7   :  { %v982_v30 = vmax.f32 %v948_v29, 0.0  ;;  %v2340_v29 = vadd.f32 %v795_v24, %v662_v21  ;;  %v1690_v21 = vld [vmem:[#allocation5 + $0x18] sm:$0xff] }
 0x3e9   :  { %1060 = vmatmul.f32.gmra.mxu0 %v982_v30  ;;  %1125 = vmatmul.f32.gmra.mxu1 %v982_v30  ;;  %1479 = vst [vmem:[#allocation22 + $0x70] sm:$0xff] %v2340_v29  ;;  %v1654_v30 = vpop.eup %1653 }
 0x3ea   :  { %v796_v38 = vmul.f32 %v1654_v30, %v748_v37  ;;  %v1696_v37 = vld [vmem:[#allocation5 + $0x48] sm:$0xff] }
 0x3ee   :  { %v951_v39 = vpop.f32.mrf.mxu3 }
 0x3ef   :  { %v983_v40 = vmax.f32 %v951_v39, 0.0  ;;  %v665_v39 = vpop.f32.mrf.mxu0 }
 0x3f1   :  { %1063 = vmatmul.f32.gmra.mxu0 %v983_v40  ;;  %1128 = vmatmul.f32.gmra.mxu1 %v983_v40  ;;  %v2343_v40 = vadd.f32 %v796_v38, %v665_v39  ;;  %v1697_v39 = vld [vmem:[#allocation5 + $0x50] sm:$0xff] }
 0x3f3   :  { %1480 = vst [vmem:[#allocation22 + $0x78] sm:$0xff] %v2343_v40 }
 0x3f4   :  { %1510 = dma.vmem_to_hbm [thread:$0]  %s1503_s16, 2048, %s1505_s15, [#allocation4], %s2082_s21, %s2082_s21, %s2083_s22  }
 0x3f6   :  { %v954_v53 = vpop.f32.mrf.mxu3 }
 0x3f7   :  { %v984_v54 = vmax.f32 %v954_v53, 0.0 }
 0x3f9   :  { %1066 = vmatmul.f32.gmra.mxu0 %v984_v54  ;;  %1131 = vmatmul.f32.gmra.mxu1 %v984_v54 }
 0x3fe   :  { %v957_v3 = vpop.f32.mrf.mxu3 }
 0x3ff   :  { %v985_v4 = vmax.f32 %v957_v3, 0.0 }
 0x401   :  { %1069 = vmatmul.f32.gmra.mxu0 %v985_v4  ;;  %1134 = vmatmul.f32.gmra.mxu1 %v985_v4 }
 0x406   :  { %v960_v19 = vpop.f32.mrf.mxu3 }
 0x407   :  { %v986_v20 = vmax.f32 %v960_v19, 0.0  ;;  %v1689_v19 = vld [vmem:[#allocation5 + $0x10] sm:$0xff] }
 0x409   :  { %1072 = vmatmul.f32.gmra.mxu0 %v986_v20  ;;  %1137 = vmatmul.f32.gmra.mxu1 %v986_v20 }
 0x40e   :  { %v963_v32 = vpop.f32.mrf.mxu3 }
 0x40f   :  { %v987_v35 = vmax.f32 %v963_v32, 0.0 }
 0x411   :  { %1075 = vmatmul.f32.gmra.mxu0 %v987_v35  ;;  %1140 = vmatmul.f32.gmra.mxu1 %v987_v35 }
 0x416   :  { %v966_v41 = vpop.f32.mrf.mxu3 }
 0x417   :  { %v988_v42 = vmax.f32 %v966_v41, 0.0  ;;  %v1698_v41 = vld [vmem:[#allocation5 + $0x58] sm:$0xff] }
 0x419   :  { %1078 = vmatmul.f32.gmra.mxu0 %v988_v42  ;;  %1143 = vmatmul.f32.gmra.mxu1 %v988_v42  ;;  %v1699_v42 = vld [vmem:[#allocation5 + $0x60] sm:$0xff] }
 0x41e   :  { %v969_v44 = vpop.f32.mrf.mxu3 }
 0x41f   :  { %v989_v45 = vmax.f32 %v969_v44, 0.0 }
 0x421   :  { %1081 = vmatmul.f32.gmra.mxu0 %v989_v45  ;;  %1146 = vmatmul.f32.gmra.mxu1 %v989_v45  ;;  %v1700_v45 = vld [vmem:[#allocation5 + $0x68] sm:$0xff] }
 0x426   :  { %v972_v46 = vpop.f32.mrf.mxu3 }
 0x427   :  { %v990_v48 = vmax.f32 %v972_v46, 0.0  ;;  %v1701_v46 = vld [vmem:[#allocation5 + $0x70] sm:$0xff] }
 0x429   :  { %1084 = vmatmul.f32.gmra.mxu0 %v990_v48  ;;  %1149 = vmatmul.f32.gmra.mxu1 %v990_v48  ;;  %v1702_v48 = vld [vmem:[#allocation5 + $0x78] sm:$0xff] }
 0x42e   :  { %v2346_v49 = vpop.f32.mrf.mxu0  ;;  %v2348_v50 = vpop.f32.mrf.mxu1 }
 0x431   :  { %1396 = vmatmul.f32.vlgmr.msrb.gmra.mxu0 %v2297_v9 }
 0x436   :  { %v2351_v51 = vpop.f32.mrf.mxu0  ;;  %v2353_v53 = vpop.f32.mrf.mxu1 }
 0x439   :  { %1399 = vmatmul.f32.gmra.mxu0 %v2301_v18 }
 0x43e   :  { %v2356_v54 = vpop.f32.mrf.mxu0  ;;  %v2358_v55 = vpop.f32.mrf.mxu1 }
 0x441   :  { %1402 = vmatmul.f32.gmra.mxu0 %v2304_v25 }
 0x446   :  { %v2361_v56 = vpop.f32.mrf.mxu0  ;;  %v2363_v57 = vpop.f32.mrf.mxu1 }
 0x449   :  { %1405 = vmatmul.f32.gmra.mxu0 %v2307_v34 }
 0x44e   :  { %v1052_v58 = vpop.f32.mrf.mxu0  ;;  %v1117_v9 = vpop.f32.mrf.mxu1 }
 0x451   :  { %1408 = vmatmul.f32.gmra.mxu0 %v2310_v43 }
 0x456   :  { %v1055_v59 = vpop.f32.mrf.mxu0  ;;  %v1120_v61 = vpop.f32.mrf.mxu1 }
 0x459   :  { %1411 = vmatmul.f32.gmra.mxu0 %v2313_v52 }
 0x45e   :  { %v1058_v18 = vpop.f32.mrf.mxu0  ;;  %v1123_v63 = vpop.f32.mrf.mxu1 }
 0x461   :  { %1414 = vmatmul.f32.gmra.mxu0 %v2316_v60 }
 0x466   :  { %v1061_v0 = vpop.f32.mrf.mxu0  ;;  %v1126_v25 = vpop.f32.mrf.mxu1 }
 0x469   :  { %1417 = vmatmul.f32.gmra.mxu0 %v2319_v5 }
 0x46e   :  { %v1064_v1 = vpop.f32.mrf.mxu0  ;;  %v1129_v2 = vpop.f32.mrf.mxu1 }
 0x471   :  { %1420 = vmatmul.f32.gmra.mxu0 %v2322_v15 }
 0x476   :  { %v1067_v34 = vpop.f32.mrf.mxu0  ;;  %v1132_v3 = vpop.f32.mrf.mxu1 }
 0x479   :  { %1423 = vmatmul.f32.gmra.mxu0 %v2325_v26 }
 0x47e   :  { %v1070_v43 = vpop.f32.mrf.mxu0  ;;  %v1135_v4 = vpop.f32.mrf.mxu1 }
 0x481   :  { %1426 = vmatmul.f32.gmra.mxu0 %v2328_v36 }
 0x486   :  { %v1073_v52 = vpop.f32.mrf.mxu0  ;;  %v1138_v6 = vpop.f32.mrf.mxu1 }
 0x489   :  { %1429 = vmatmul.f32.gmra.mxu0 %v2331_v47 }
 0x48e   :  { %v1076_v60 = vpop.f32.mrf.mxu0  ;;  %v1141_v7 = vpop.f32.mrf.mxu1 }
 0x491   :  { %1432 = vmatmul.f32.gmra.mxu0 %v2334_v62 }
 0x496   :  { %v1079_v5 = vpop.f32.mrf.mxu0  ;;  %v1144_v8 = vpop.f32.mrf.mxu1 }
 0x499   :  { %1435 = vmatmul.f32.gmra.mxu0 %v2337_v13  ;;  %v1687_v13 = vld [vmem:[#allocation5] sm:$0xff] }
 0x49e   :  { %v1082_v15 = vpop.f32.mrf.mxu0  ;;  %v1147_v10 = vpop.f32.mrf.mxu1 }
 0x4a1   :  { %1438 = vmatmul.f32.gmra.mxu0 %v2340_v29  ;;  %v1693_v29 = vld [vmem:[#allocation5 + $0x30] sm:$0xff] }
 0x4a6   :  { %v1085_v26 = vpop.f32.mrf.mxu0  ;;  %v1150_v11 = vpop.f32.mrf.mxu1 }
 0x4a7   :  { %1153 = vmatpush.msrb.mxu2 %v1085_v26  ;;  %1218 = vmatpush.msrb.mxu3 %v1150_v11 }
 0x4a9   :  { %1154 = vmatpush.msrb.mxu2 %v1082_v15  ;;  %1219 = vmatpush.msrb.mxu3 %v1147_v10 }
 0x4aa   :  { %1441 = vmatmul.f32.gmra.mxu0 %v2343_v40 }
 0x4ab   :  { %1155 = vmatpush.msrb.mxu2 %v1079_v5  ;;  %1220 = vmatpush.msrb.mxu3 %v1144_v8 }
 0x4ad   :  { %1156 = vmatpush.msrb.mxu2 %v1076_v60  ;;  %1221 = vmatpush.msrb.mxu3 %v1141_v7  ;;  %v1286_v7 = vld [vmem:[#allocation20 + $0x18] sm:$0xff] }
 0x4ae   :  { %v2378_v36 = vpop.f32.mrf.mxu0 }
 0x4af   :  { %1157 = vmatpush.msrb.mxu2 %v1073_v52  ;;  %1222 = vmatpush.msrb.mxu3 %v1138_v6 }
 0x4b1   :  { %1158 = vmatpush.msrb.mxu2 %v1070_v43  ;;  %1223 = vmatpush.msrb.mxu3 %v1135_v4 }
 0x4b3   :  { %1159 = vmatpush.msrb.mxu2 %v1067_v34  ;;  %1224 = vmatpush.msrb.mxu3 %v1132_v3  ;;  %v1285_v34 = vld [vmem:[#allocation20 + $0x10] sm:$0xff] }
 0x4b5   :  { %1160 = vmatpush.msrb.mxu2 %v1064_v1  ;;  %1225 = vmatpush.msrb.mxu3 %v1129_v2 }
 0x4b6   :  { %v2380_v47 = vpop.f32.mrf.mxu0 }
 0x4b7   :  { %1161 = vmatpush.msrb.mxu2 %v1061_v0  ;;  %1226 = vmatpush.msrb.mxu3 %v1126_v25 }
 0x4b9   :  { %1162 = vmatpush.msrb.mxu2 %v1058_v18  ;;  %1227 = vmatpush.msrb.mxu3 %v1123_v63 }
 0x4bb   :  { %1163 = vmatpush.msrb.mxu2 %v1055_v59  ;;  %1228 = vmatpush.msrb.mxu3 %v1120_v61  ;;  %v1284_v61 = vld [vmem:[#allocation20 + $0x8] sm:$0xff] }
 0x4bd   :  { %1164 = vmatpush.msrb.mxu2 %v1052_v58  ;;  %1229 = vmatpush.msrb.mxu3 %v1117_v9 }
 0x4be   :  { %v2382_v62 = vpop.f32.mrf.mxu0 }
 0x4bf   :  { %1165 = vmatpush.msrb.mxu2 %v2361_v56  ;;  %1230 = vmatpush.msrb.mxu3 %v2363_v57 }
 0x4c1   :  { %1166 = vmatpush.msrb.mxu2 %v2356_v54  ;;  %1231 = vmatpush.msrb.mxu3 %v2358_v55  ;;  %v1283_v54 = vld [vmem:[#allocation20] sm:$0xff] }
 0x4c3   :  { %1167 = vmatpush.msrb.mxu2 %v2351_v51  ;;  %1232 = vmatpush.msrb.mxu3 %v2353_v53 }
 0x4c5   :  { %1168 = vmatpush.msrb.mxu2 %v2346_v49  ;;  %1233 = vmatpush.msrb.mxu3 %v2348_v50  ;;  %v1363_v49 = vld [vmem:[#allocation7] sm:$0xff] }
 0x4c6   :  { %v2392_v12 = vpop.f32.mrf.mxu0  ;;  %1234 = vmatmul.f32.vlgmr.msrb.gmra.mxu3 %v1687_v13  ;;  %1169 = vmatmul.f32.vlgmr.msrb.gmra.mxu2 %v1687_v13 }
 0x4ce   :  { %v2394_v14 = vpop.f32.mrf.mxu0  ;;  %1237 = vmatmul.f32.gmra.mxu3 %v1688_v16  ;;  %1172 = vmatmul.f32.gmra.mxu2 %v1688_v16 }
 0x4d6   :  { %v1412_v17 = vpop.f32.mrf.mxu0  ;;  %1240 = vmatmul.f32.gmra.mxu3 %v1689_v19  ;;  %1175 = vmatmul.f32.gmra.mxu2 %v1689_v19 }
 0x4de   :  { %v1415_v20 = vpop.f32.mrf.mxu0  ;;  %1243 = vmatmul.f32.gmra.mxu3 %v1690_v21  ;;  %1178 = vmatmul.f32.gmra.mxu2 %v1690_v21 }
 0x4e6   :  { %v1418_v22 = vpop.f32.mrf.mxu0  ;;  %1246 = vmatmul.f32.gmra.mxu3 %v1691_v23  ;;  %1181 = vmatmul.f32.gmra.mxu2 %v1691_v23 }
 0x4ee   :  { %v1421_v24 = vpop.f32.mrf.mxu0  ;;  %1249 = vmatmul.f32.gmra.mxu3 %v1692_v27  ;;  %1184 = vmatmul.f32.gmra.mxu2 %v1692_v27  ;;  %v1289_v27 = vld [vmem:[#allocation20 + $0x30] sm:$0xff] }
 0x4f6   :  { %v1424_v28 = vpop.f32.mrf.mxu0  ;;  %1252 = vmatmul.f32.gmra.mxu3 %v1693_v29  ;;  %1187 = vmatmul.f32.gmra.mxu2 %v1693_v29 }
 0x4fe   :  { %v1427_v30 = vpop.f32.mrf.mxu0  ;;  %1255 = vmatmul.f32.gmra.mxu3 %v1694_v31  ;;  %1190 = vmatmul.f32.gmra.mxu2 %v1694_v31 }
 0x506   :  { %v1430_v32 = vpop.f32.mrf.mxu0  ;;  %1258 = vmatmul.f32.gmra.mxu3 %v1695_v33  ;;  %1193 = vmatmul.f32.gmra.mxu2 %v1695_v33 }
 0x50e   :  { %v1433_v35 = vpop.f32.mrf.mxu0  ;;  %1261 = vmatmul.f32.gmra.mxu3 %v1696_v37  ;;  %1196 = vmatmul.f32.gmra.mxu2 %v1696_v37 }
 0x516   :  { %v1436_v38 = vpop.f32.mrf.mxu0  ;;  %1264 = vmatmul.f32.gmra.mxu3 %v1697_v39  ;;  %1199 = vmatmul.f32.gmra.mxu2 %v1697_v39 }
 0x51e   :  { %v1439_v40 = vpop.f32.mrf.mxu0  ;;  %1267 = vmatmul.f32.gmra.mxu3 %v1698_v41  ;;  %1202 = vmatmul.f32.gmra.mxu2 %v1698_v41 }
 0x526   :  { %1270 = vmatmul.f32.gmra.mxu3 %v1699_v42  ;;  %1205 = vmatmul.f32.gmra.mxu2 %v1699_v42 }
 0x527   :  { %v1442_v44 = vpop.f32.mrf.mxu0 }
 0x528   :  { %1445 = vmatpush.msra.mxu1 %v1442_v44  ;;  %v1291_v44 = vld [vmem:[#allocation20 + $0x40] sm:$0xff] }
 0x52a   :  { %1446 = vmatpush.msra.mxu1 %v1439_v40 }
 0x52c   :  { %1447 = vmatpush.msra.mxu1 %v1436_v38 }
 0x52e   :  { %1448 = vmatpush.msra.mxu1 %v1433_v35  ;;  %1273 = vmatmul.f32.gmra.mxu3 %v1700_v45  ;;  %v1290_v35 = vld [vmem:[#allocation20 + $0x38] sm:$0xff] }
 0x52f   :  { %1208 = vmatmul.f32.gmra.mxu2 %v1700_v45 }
 0x530   :  { %1449 = vmatpush.msra.mxu1 %v1430_v32 }
 0x532   :  { %1450 = vmatpush.msra.mxu1 %v1427_v30 }
 0x534   :  { %1451 = vmatpush.msra.mxu1 %v1424_v28 }
 0x536   :  { %1452 = vmatpush.msra.mxu1 %v1421_v24  ;;  %1276 = vmatmul.f32.gmra.mxu3 %v1701_v46 }
 0x537   :  { %1211 = vmatmul.f32.gmra.mxu2 %v1701_v46 }
 0x538   :  { %1453 = vmatpush.msra.mxu1 %v1418_v22 }
 0x53a   :  { %1454 = vmatpush.msra.mxu1 %v1415_v20 }
 0x53c   :  { %1455 = vmatpush.msra.mxu1 %v1412_v17  ;;  %v1288_v17 = vld [vmem:[#allocation20 + $0x28] sm:$0xff] }
 0x53e   :  { %1456 = vmatpush.msra.mxu1 %v2394_v14  ;;  %1279 = vmatmul.f32.gmra.mxu3 %v1702_v48 }
 0x53f   :  { %1214 = vmatmul.f32.gmra.mxu2 %v1702_v48 }
 0x540   :  { %1457 = vmatpush.msra.mxu1 %v2392_v12 }
 0x542   :  { %1458 = vmatpush.msra.mxu1 %v2382_v62 }
 0x544   :  { %1459 = vmatpush.msra.mxu1 %v2380_v47 }
 0x546   :  { %1460 = vmatpush.msra.mxu1 %v2378_v36  ;;  %v1287_v36 = vld [vmem:[#allocation20 + $0x20] sm:$0xff] }
 0x547   :  { %1461 = vmatmul.f32.vlgmr.msra.gmra.mxu1 %v1363_v49 }
 0x549   :  { %v1235_v50 = vpop.f32.mrf.mxu3  ;;  %v1170_v51 = vpop.f32.mrf.mxu2 }
 0x54a   :  { %v1299_v53 = vmul.f32 1.442695, %v1235_v50 }
 0x54c   :  { %1655 = vpow2.f32 %v1299_v53  ;;  %v1292_v53 = vld [vmem:[#allocation20 + $0x48] sm:$0xff] }
 0x551   :  { %v1238_v55 = vpop.f32.mrf.mxu3  ;;  %v1173_v56 = vpop.f32.mrf.mxu2 }
 0x552   :  { %v1656_v57 = vpop.eup %1655  ;;  %v1301_v58 = vmul.f32 1.442695, %v1238_v55 }
 0x553   :  { %v1331_v9 = vmul.f32 %v1656_v57, %v1283_v54 }
 0x554   :  { %1657 = vpow2.f32 %v1301_v58 }
 0x555   :  { %v1347_v59 = vadd.f32 %v1331_v9, %v1170_v51 }
 0x557   :  { %1481 = vst [vmem:[#allocation23] sm:$0xff] %v1347_v59  ;;  %v1293_v59 = vld [vmem:[#allocation20 + $0x50] sm:$0xff] }
 0x559   :  { %v1241_v18 = vpop.f32.mrf.mxu3  ;;  %v1176_v63 = vpop.f32.mrf.mxu2 }
 0x55a   :  { %v1658_v0 = vpop.eup %1657  ;;  %v1303_v25 = vmul.f32 1.442695, %v1241_v18 }
 0x55b   :  { %v1332_v1 = vmul.f32 %v1658_v0, %v1284_v61 }
 0x55c   :  { %1659 = vpow2.f32 %v1303_v25 }
 0x55d   :  { %v1348_v2 = vadd.f32 %v1332_v1, %v1173_v56 }
 0x55f   :  { %1482 = vst [vmem:[#allocation23 + $0x8] sm:$0xff] %v1348_v2  ;;  %v1294_v2 = vld [vmem:[#allocation20 + $0x58] sm:$0xff] }
 0x561   :  { %v1244_v3 = vpop.f32.mrf.mxu3  ;;  %v1179_v43 = vpop.f32.mrf.mxu2 }
 0x562   :  { %v1660_v4 = vpop.eup %1659  ;;  %v1305_v52 = vmul.f32 1.442695, %v1244_v3 }
 0x563   :  { %v1333_v6 = vmul.f32 %v1660_v4, %v1285_v34 }
 0x564   :  { %1661 = vpow2.f32 %v1305_v52 }
 0x565   :  { %v1349_v60 = vadd.f32 %v1333_v6, %v1176_v63 }
 0x567   :  { %1483 = vst [vmem:[#allocation23 + $0x10] sm:$0xff] %v1349_v60  ;;  %v1295_v60 = vld [vmem:[#allocation20 + $0x60] sm:$0xff] }
 0x569   :  { %v1247_v5 = vpop.f32.mrf.mxu3  ;;  %v1182_v8 = vpop.f32.mrf.mxu2 }
 0x56a   :  { %v1662_v15 = vpop.eup %1661  ;;  %v1307_v10 = vmul.f32 1.442695, %v1247_v5 }
 0x56b   :  { %v1334_v26 = vmul.f32 %v1662_v15, %v1286_v7 }
 0x56c   :  { %1663 = vpow2.f32 %v1307_v10 }
 0x56d   :  { %v1350_v11 = vadd.f32 %v1334_v26, %v1179_v43 }
 0x56f   :  { %1484 = vst [vmem:[#allocation23 + $0x18] sm:$0xff] %v1350_v11  ;;  %v1296_v11 = vld [vmem:[#allocation20 + $0x68] sm:$0xff] }
 0x571   :  { %v1250_v47 = vpop.f32.mrf.mxu3  ;;  %v1185_v62 = vpop.f32.mrf.mxu2 }
 0x572   :  { %v1664_v12 = vpop.eup %1663  ;;  %v1309_v13 = vmul.f32 1.442695, %v1250_v47 }
 0x573   :  { %v1335_v14 = vmul.f32 %v1664_v12, %v1287_v36 }
 0x574   :  { %1665 = vpow2.f32 %v1309_v13 }
 0x575   :  { %v1351_v16 = vadd.f32 %v1335_v14, %v1182_v8 }
 0x577   :  { %1485 = vst [vmem:[#allocation23 + $0x20] sm:$0xff] %v1351_v16  ;;  %v1297_v16 = vld [vmem:[#allocation20 + $0x70] sm:$0xff] }
 0x579   :  { %v1253_v19 = vpop.f32.mrf.mxu3  ;;  %v1188_v20 = vpop.f32.mrf.mxu2 }
 0x57a   :  { %v1666_v21 = vpop.eup %1665  ;;  %v1311_v22 = vmul.f32 1.442695, %v1253_v19 }
 0x57b   :  { %v1336_v23 = vmul.f32 %v1666_v21, %v1288_v17 }
 0x57c   :  { %1667 = vpow2.f32 %v1311_v22 }
 0x57d   :  { %v1352_v24 = vadd.f32 %v1336_v23, %v1185_v62 }
 0x57f   :  { %1486 = vst [vmem:[#allocation23 + $0x28] sm:$0xff] %v1352_v24  ;;  %v1298_v24 = vld [vmem:[#allocation20 + $0x78] sm:$0xff] }
 0x581   :  { %v1256_v28 = vpop.f32.mrf.mxu3  ;;  %v1191_v29 = vpop.f32.mrf.mxu2 }
 0x582   :  { %v1668_v30 = vpop.eup %1667  ;;  %v1313_v31 = vmul.f32 1.442695, %v1256_v28 }
 0x583   :  { %v1337_v32 = vmul.f32 %v1668_v30, %v1289_v27 }
 0x584   :  { %1669 = vpow2.f32 %v1313_v31 }
 0x585   :  { %v1353_v33 = vadd.f32 %v1337_v32, %v1188_v20 }
 0x587   :  { %1487 = vst [vmem:[#allocation23 + $0x30] sm:$0xff] %v1353_v33 }
 0x589   :  { %v1259_v37 = vpop.f32.mrf.mxu3  ;;  %v1194_v38 = vpop.f32.mrf.mxu2 }
 0x58a   :  { %v1670_v39 = vpop.eup %1669  ;;  %v1315_v40 = vmul.f32 1.442695, %v1259_v37 }
 0x58b   :  { %v1338_v41 = vmul.f32 %v1670_v39, %v1290_v35 }
 0x58c   :  { %1671 = vpow2.f32 %v1315_v40 }
 0x58d   :  { %v1354_v42 = vadd.f32 %v1338_v41, %v1191_v29 }
 0x58f   :  { %1488 = vst [vmem:[#allocation23 + $0x38] sm:$0xff] %v1354_v42 }
 0x591   :  { %v1262_v45 = vpop.f32.mrf.mxu3  ;;  %v1197_v46 = vpop.f32.mrf.mxu2 }
 0x592   :  { %v1672_v48 = vpop.eup %1671  ;;  %v1317_v49 = vmul.f32 1.442695, %v1262_v45 }
 0x593   :  { %v1339_v50 = vmul.f32 %v1672_v48, %v1291_v44 }
 0x594   :  { %1673 = vpow2.f32 %v1317_v49 }
 0x595   :  { %v1355_v51 = vadd.f32 %v1339_v50, %v1194_v38 }
 0x597   :  { %1489 = vst [vmem:[#allocation23 + $0x40] sm:$0xff] %v1355_v51 }
 0x599   :  { %v1265_v54 = vpop.f32.mrf.mxu3  ;;  %v1200_v55 = vpop.f32.mrf.mxu2 }
 0x59a   :  { %v1674_v56 = vpop.eup %1673  ;;  %v1319_v57 = vmul.f32 1.442695, %v1265_v54 }
 0x59b   :  { %v1340_v58 = vmul.f32 %v1674_v56, %v1292_v53 }
 0x59c   :  { %1675 = vpow2.f32 %v1319_v57 }
 0x59d   :  { %v1356_v9 = vadd.f32 %v1340_v58, %v1197_v46 }
 0x59f   :  { %1490 = vst [vmem:[#allocation23 + $0x48] sm:$0xff] %v1356_v9 }
 0x5a1   :  { %v1268_v61 = vpop.f32.mrf.mxu3  ;;  %v1203_v0 = vpop.f32.mrf.mxu2 }
 0x5a2   :  { %v1676_v18 = vpop.eup %1675  ;;  %v1321_v63 = vmul.f32 1.442695, %v1268_v61 }
 0x5a3   :  { %v1341_v25 = vmul.f32 %v1676_v18, %v1293_v59 }
 0x5a4   :  { %1677 = vpow2.f32 %v1321_v63 }
 0x5a5   :  { %v1357_v1 = vadd.f32 %v1341_v25, %v1200_v55 }
 0x5a7   :  { %1491 = vst [vmem:[#allocation23 + $0x50] sm:$0xff] %v1357_v1 }
 0x5a9   :  { %v1271_v34 = vpop.f32.mrf.mxu3  ;;  %v1206_v52 = vpop.f32.mrf.mxu2 }
 0x5aa   :  { %v1678_v3 = vpop.eup %1677  ;;  %v1323_v43 = vmul.f32 1.442695, %v1271_v34 }
 0x5ab   :  { %v1342_v4 = vmul.f32 %v1678_v3, %v1294_v2 }
 0x5ac   :  { %1679 = vpow2.f32 %v1323_v43 }
 0x5ad   :  { %v1358_v6 = vadd.f32 %v1342_v4, %v1203_v0 }
 0x5af   :  { %1492 = vst [vmem:[#allocation23 + $0x58] sm:$0xff] %v1358_v6 }
 0x5b1   :  { %v1274_v7 = vpop.f32.mrf.mxu3 }
 0x5b2   :  { %v1680_v5 = vpop.eup %1679  ;;  %v1325_v8 = vmul.f32 1.442695, %v1274_v7  ;;  %v1209_v26 = vpop.f32.mrf.mxu2 }
 0x5b3   :  { %v1343_v15 = vmul.f32 %v1680_v5, %v1295_v60 }
 0x5b4   :  { %1681 = vpow2.f32 %v1325_v8 }
 0x5b5   :  { %v1359_v10 = vadd.f32 %v1343_v15, %v1206_v52 }
 0x5b7   :  { %1493 = vst [vmem:[#allocation23 + $0x60] sm:$0xff] %v1359_v10 }
 0x5b9   :  { %v1277_v36 = vpop.f32.mrf.mxu3 }
 0x5ba   :  { %v1682_v47 = vpop.eup %1681  ;;  %v1327_v62 = vmul.f32 1.442695, %v1277_v36  ;;  %v1212_v14 = vpop.f32.mrf.mxu2 }
 0x5bb   :  { %v1344_v12 = vmul.f32 %v1682_v47, %v1296_v11 }
 0x5bc   :  { %1683 = vpow2.f32 %v1327_v62 }
 0x5bd   :  { %v1360_v13 = vadd.f32 %v1344_v12, %v1209_v26 }
 0x5bf   :  { %1494 = vst [vmem:[#allocation23 + $0x68] sm:$0xff] %v1360_v13 }
 0x5c1   :  { %v1280_v17 = vpop.f32.mrf.mxu3 }
 0x5c2   :  { %v1684_v19 = vpop.eup %1683  ;;  %v1329_v20 = vmul.f32 1.442695, %v1280_v17  ;;  %v1215_v28 = vpop.f32.mrf.mxu2 }
 0x5c3   :  { %v1345_v21 = vmul.f32 %v1684_v19, %v1297_v16 }
 0x5c4   :  { %1685 = vpow2.f32 %v1329_v20  ;;  %v1462_v22 = vpop.f32.mrf.mxu1 }
 0x5c5   :  { %v1361_v23 = vadd.f32 %v1345_v21, %v1212_v14  ;;  %1497 = vst [vmem:[#allocation25] sm:$0xff] %v1462_v22 }
 0x5c7   :  { %1495 = vst [vmem:[#allocation23 + $0x70] sm:$0xff] %v1361_v23 }
 0x5ca   :  { %v1686_v27 = vpop.eup %1685 }
 0x5cb   :  { %v1346_v29 = vmul.f32 %v1686_v27, %v1298_v24 }
 0x5cd   :  { %v1362_v30 = vadd.f32 %v1346_v29, %v1215_v28 }
 0x5cf   :  { %1496 = vst [vmem:[#allocation23 + $0x78] sm:$0xff] %v1362_v30 }
 0x5d0   :  { %1523 = dma.vmem_to_hbm [thread:$0]  %s1516_s17, 2048, %s1518_s2, [#allocation24], %s2082_s21, %s2082_s21, %s2083_s22  }
 0x5d1   :  { %1534 = dma.vmem_to_hbm [thread:$0]  %s1530_s20, 128, %s1532_s24, [#allocation24]  }
 0x5d2   :  { %2077 = dma.done.wait [#allocation4], 2048  }
 0x5d3   :  { %2078 = vsyncadd [#allocation4], 4294965248 }
 0x5d4   :  { %2079 = dma.done.wait [#allocation24], 2176  }
 0x5d5   :  { %2080 = vsyncadd [#allocation24], 4294965120 }
 0x5d6   :  { %1547 = vsyncpa [#allocation3], 1 }
 0x5d7   :  { %1548 = vsyncpa [#allocation6], 1 }
 0x5d8   :  { %1549 = vsyncpa [#allocation9], 1 }
 0x5d9   :  { %1550 = vsyncpa [#allocation12], 1 }
 0x5da   :  { %1551 = vsyncpa [#allocation15], 1 }
 0x5db   :  { %1552 = vsyncpa [#allocation18], 1 }
 0x5dc   :  { %1553 = vsyncpa [#allocation21], 1 }
 0x5dd   :  { %1554 = vsyncpa [#allocation4], 1 }
 0x5de   :  { %1555 = vsyncpa [#allocation24], 1 }

</bundles_post_ra>
